<compile_context>
chip_gen: v6e
topology: v6e:2x2x1
jax: 0.10.0
libtpu: 0.0.40
codegen_flags: <defaults>
</compile_context>

<pallas_src>
import functools

import jax
import jax.numpy as jnp
from jax.experimental import pallas as pl
from jax.experimental.pallas import tpu as pltpu


def _round_up(n, m):
    return ((n + m - 1) // m) * m


def _num_tensorcores():
    """Best-effort TensorCore count per Pallas device (perf-only heuristic)."""
    try:
        kind = jax.devices()[0].device_kind.lower()
    except Exception:
        return 1
    if "v7" in kind:
        return 2
    if "v5p" in kind or ("v4" in kind and "lite" not in kind):
        return 2  # megacore
    return 1


def _rnn_doublehead_kernel(x_ref, w_ih_ref, w_hh_ref, b_lstm_ref,
                           w1_ref, b1_ref, w2_ref, b2_ref, wh_ref, bh_ref,
                           out_ref, *, seq_len, hidden, sel):
    """Whole forward pass for one batch tile, entirely in VMEM.

    x_ref:      (TB, T)        scalar LSTM inputs per time step (batch on sublanes)
    w_ih_ref:   (1, 4H)        LSTM input weights, gate order (i, f, o, g)
    w_hh_ref:   (H, 4H)        LSTM recurrent weights (transposed vs. PyTorch)
    b_lstm_ref: (1, 4H)        b_ih + b_hh, same gate order
    w1_ref:     (T*H, H1)      linear1 weight (transposed), b1_ref (1, H1)
    w2_ref:     (H1, H2)       linear2 weight (transposed), b2_ref (1, H2)
    wh_ref:     (H2, O_pad)    head weight (linear4 if sel else linear3),
                               zero-padded to 128 lanes; bh_ref (1, O_pad)
                               padded with -1e30 (sel) / 0 (not sel)
    out_ref:    (TB, O_pad)    lane-dense output tile
    """
    H = hidden
    T = seq_len
    TB = x_ref.shape[0]
    H1 = w1_ref.shape[1]

    x = x_ref[...]            # (TB, T)
    w_ih = w_ih_ref[...]      # (1, 4H)
    b_lstm = b_lstm_ref[...]  # (1, 4H)
    w_hh = w_hh_ref[...]      # (H, 4H)

    # Serial LSTM recurrence (fully unrolled, one basic block).  The input
    # projection x_t*w_ih + b_lstm and the per-step linear1 contribution are
    # dependence-free w.r.t. h/c, so the LLO scheduler overlaps them with the
    # h -> gates -> h chain (MXU dot + add + 2 EUP launches per step).
    h = jnp.zeros((TB, H), jnp.float32)
    c = jnp.zeros((TB, H), jnp.float32)
    res1 = jnp.zeros((TB, H1), jnp.float32)
    for t in range(T):
        gates = (x[:, t:t + 1] * w_ih + b_lstm
                 + jnp.dot(h, w_hh, preferred_element_type=jnp.float32))
        sig = jax.nn.sigmoid(gates[:, :3 * H])                   # i | f | o
        g_g = jnp.tanh(gates[:, 3 * H:])                         # g
        i_g = sig[:, 0 * H:1 * H]
        f_g = sig[:, 1 * H:2 * H]
        o_g = sig[:, 2 * H:3 * H]
        c = f_g * c + i_g * g_g
        h = o_g * jnp.tanh(c)
        # linear1 accumulation for this time step (off the h->h chain):
        # flat @ w1 == sum_t h_t @ w1[t*H:(t+1)*H, :]   (time-major flatten)
        res1 = res1 + jnp.dot(h, w1_ref[t * H:(t + 1) * H, :],
                              preferred_element_type=jnp.float32)

    # MLP head.
    res1 = jnp.maximum(res1 + b1_ref[...], 0.0)                  # relu(linear1)
    res2 = (jnp.dot(res1, w2_ref[...], preferred_element_type=jnp.float32)
            + b2_ref[...])                                       # linear2
    head = (jnp.dot(res2, wh_ref[...], preferred_element_type=jnp.float32)
            + bh_ref[...])                                       # linear4 / linear3

    if sel:
        # LogSoftmax over dim=1.  Padded columns carry bias -1e30: they never
        # win the max and exp(-1e30 - m) == 0, so real columns are exact.
        m = jnp.max(head, axis=1, keepdims=True)
        lse = m + jnp.log(jnp.sum(jnp.exp(head - m), axis=1, keepdims=True))
        out_ref[...] = head - lse
    else:
        out_ref[...] = head


def _permute_gates(w, H):
    """PyTorch LSTM gate order (i, f, g, o) -> kernel order (i, f, o, g)."""
    return jnp.concatenate(
        [w[..., 0 * H:2 * H], w[..., 3 * H:4 * H], w[..., 2 * H:3 * H]],
        axis=-1)


def init_params(key, ins, hs0, hs2, n_os):
    """Deterministic synthetic parameters (PyTorch-style uniform init), stored
    transposed to (in, out) layout, PyTorch gate order (i, f, g, o)."""
    ks = jax.random.split(key, 12)
    u = lambda k, shape, bound: jax.random.uniform(
        k, shape, jnp.float32, -bound, bound)

    k_lstm = 1.0 / float(hs0) ** 0.5
    params = {
        "w_ih": u(ks[0], (1, 4 * hs0), k_lstm),
        "w_hh": u(ks[1], (hs0, 4 * hs0), k_lstm),
        "b_lstm": u(ks[2], (1, 4 * hs0), k_lstm) + u(ks[3], (1, 4 * hs0), k_lstm),
        "w1": u(ks[4], (ins * hs0, hs0), 1.0 / float(ins * hs0) ** 0.5),
        "b1": u(ks[5], (1, hs0), 1.0 / float(ins * hs0) ** 0.5),
        "w2": u(ks[6], (hs0, hs2), 1.0 / float(hs0) ** 0.5),
        "b2": u(ks[7], (1, hs2), 1.0 / float(hs0) ** 0.5),
        "w3": u(ks[8], (hs2, n_os), 1.0 / float(hs2) ** 0.5),
        "b3": u(ks[9], (1, n_os), 1.0 / float(hs2) ** 0.5),
        "w4": u(ks[10], (hs2, 5), 1.0 / float(hs2) ** 0.5),
        "b4": u(ks[11], (1, 5), 1.0 / float(hs2) ** 0.5),
    }
    return params


def rnn_doublehead_forward(x, params, sel=True, block_b=None):
    """x: (B, 1, ins) float32, as passed to the PyTorch module."""
    B = x.shape[0]
    T = x.shape[2]
    H = params["w_hh"].shape[0]
    H1 = params["w1"].shape[1]
    H2 = params["w2"].shape[1]

    if sel:
        wh, bh = params["w4"], params["b4"]
    else:
        wh, bh = params["w3"], params["b3"]
    n_out = wh.shape[1]

    # Lane-dense head: pad the head weight/bias to 128 output columns so the
    # output store is a full-vreg unmasked vst; slice back in the wrapper.
    O_pad = _round_up(n_out, 128)
    pad_cols = O_pad - n_out
    if pad_cols:
        wh_p = jnp.pad(wh, ((0, 0), (0, pad_cols)))
        fill = -1e30 if sel else 0.0   # -1e30 keeps log-softmax of real cols exact
        bh_p = jnp.pad(bh, ((0, 0), (0, pad_cols)), constant_values=fill)
    else:
        wh_p, bh_p = wh, bh

    # Offline (outside-kernel) gate-column permutation: exact, zero kernel cost.
    w_ih = _permute_gates(params["w_ih"], H)
    w_hh = _permute_gates(params["w_hh"], H)
    b_lstm = _permute_gates(params["b_lstm"], H)

    # Tile the batch so that nb == number of TensorCores (1 on v5e/v6e,
    # 2 on v7x/megacore): every extra tile replays the full serial recurrence.
    if block_b is None:
        ncores = _num_tensorcores()
        block_b = _round_up((B + ncores - 1) // ncores, 8)
        block_b = min(block_b, 2048)    # VMEM guard; ~ a few KB per row
        block_b = max(block_b, 8)
    else:
        block_b = _round_up(max(8, int(block_b)), 8)
    B_pad = _round_up(B, block_b)
    nb = B_pad // block_b

    x2d = x.reshape(B, T).astype(jnp.float32)      # (B, T): time on lanes
    if B_pad != B:
        x2d = jnp.pad(x2d, ((0, B_pad - B), (0, 0)))

    kernel = functools.partial(_rnn_doublehead_kernel,
                               seq_len=T, hidden=H, sel=sel)
    const = lambda b: (0, 0)   # weights: constant block -> VMEM-resident, no re-DMA
    grid_spec = pltpu.PrefetchScalarGridSpec(
        num_scalar_prefetch=0,
        grid=(nb,),
        in_specs=[
            pl.BlockSpec((block_b, T), lambda b: (b, 0)),   # x tile
            pl.BlockSpec((1, 4 * H), const),                # w_ih
            pl.BlockSpec((H, 4 * H), const),                # w_hh
            pl.BlockSpec((1, 4 * H), const),                # b_lstm
            pl.BlockSpec((T * H, H1), const),               # w1
            pl.BlockSpec((1, H1), const),                   # b1
            pl.BlockSpec((H1, H2), const),                  # w2
            pl.BlockSpec((1, H2), const),                   # b2
            pl.BlockSpec((H2, O_pad), const),               # head weight (padded)
            pl.BlockSpec((1, O_pad), const),                # head bias (padded)
        ],
        out_specs=pl.BlockSpec((block_b, O_pad), lambda b: (b, 0)),
    )
    out = pl.pallas_call(
        kernel,
        out_shape=jax.ShapeDtypeStruct((B_pad, O_pad), jnp.float32),
        grid_spec=grid_spec,
        compiler_params=pltpu.CompilerParams(
            dimension_semantics=("parallel",),     # batch tiles -> both TCs on v7x
            vmem_limit_bytes=32 * 1024 * 1024),    # headroom above v5e's 16 MiB default
    )(x2d, w_ih, w_hh, b_lstm,
      params["w1"], params["b1"], params["w2"], params["b2"], wh_p, bh_p)
    return out[:B, :n_out]


def _reference_forward(x, params, sel=True):
    """Pure-JAX reference mirroring the PyTorch forward, for validation."""
    B, _, T = x.shape
    xs = x.reshape(B, T).astype(jnp.float32)
    H = params["w_hh"].shape[0]
    h = jnp.zeros((B, H), jnp.float32)
    c = jnp.zeros((B, H), jnp.float32)
    outs = []
    for t in range(T):
        gates = (xs[:, t:t + 1] * params["w_ih"]
                 + h @ params["w_hh"] + params["b_lstm"])
        i_g = jax.nn.sigmoid(gates[:, 0 * H:1 * H])
        f_g = jax.nn.sigmoid(gates[:, 1 * H:2 * H])
        g_g = jnp.tanh(gates[:, 2 * H:3 * H])
        o_g = jax.nn.sigmoid(gates[:, 3 * H:4 * H])
        c = f_g * c + i_g * g_g
        h = o_g * jnp.tanh(c)
        outs.append(h)
    flat = jnp.concatenate(outs, axis=1)                      # (B, T*H)
    res1 = jax.nn.relu(flat @ params["w1"] + params["b1"])
    res2 = res1 @ params["w2"] + params["b2"]
    if sel:
        return jax.nn.log_softmax(res2 @ params["w4"] + params["b4"], axis=1)
    return res2 @ params["w3"] + params["b3"]


if __name__ == "__main__":
    # Small shapes consistent with the module: ins (= seq length) = 8,
    # hs = (32, _, 16), os = 3, batch = 2. Input matches fit(): (B, 1, ins).
    B, INS, HS0, HS2, OS = 2, 8, 32, 16, 3

    key = jax.random.PRNGKey(0)
    k_x, k_p, k_xb = jax.random.split(key, 3)
    x = jax.random.normal(k_x, (B, 1, INS), jnp.float32)
    params = init_params(k_p, INS, HS0, HS2, OS)

    # Default forward path (sel=True): classification head + LogSoftmax.
    out = rnn_doublehead_forward(x, params, sel=True)
    out = jax.block_until_ready(out)
    ref = _reference_forward(x, params, sel=True)
    assert out.shape == (B, 5)
    assert jnp.allclose(out, ref, rtol=1e-5, atol=1e-5)

    # Regression head path (sel=False): linear3 output, no softmax.
    out3 = rnn_doublehead_forward(x, params, sel=False)
    out3 = jax.block_until_ready(out3)
    ref3 = _reference_forward(x, params, sel=False)
    assert out3.shape == (B, OS)
    assert jnp.allclose(out3, ref3, rtol=1e-5, atol=1e-5)

    # Batched path with the automatic (per-chip) tile choice: nb == #TCs.
    BB = 32
    xb = jax.random.normal(k_xb, (BB, 1, INS), jnp.float32)
    outb = rnn_doublehead_forward(xb, params, sel=True)
    outb = jax.block_until_ready(outb)
    refb = _reference_forward(xb, params, sel=True)
    assert outb.shape == (BB, 5)
    assert jnp.allclose(outb, refb, rtol=1e-5, atol=1e-5)

    # Forced multi-tile path (block_b=8 -> 4 grid tiles) to exercise the
    # "parallel" batch grid and padded-batch slicing.
    outg = rnn_doublehead_forward(xb, params, sel=True, block_b=8)
    outg = jax.block_until_ready(outg)
    assert jnp.allclose(outg, refb, rtol=1e-5, atol=1e-5)

    print("KERNEL_OK")
</pallas_src>

<mosaic_0001>
module attributes {stable_mosaic.version = 11 : i64} {
  func.func @_rnn_doublehead_kernel(%arg0: i32, %arg1: memref<8x8xf32, #tpu.memory_space<vmem>>, %arg2: memref<1x128xf32, #tpu.memory_space<vmem>>, %arg3: memref<32x128xf32, #tpu.memory_space<vmem>>, %arg4: memref<1x128xf32, #tpu.memory_space<vmem>>, %arg5: memref<256x32xf32, #tpu.memory_space<vmem>>, %arg6: memref<1x32xf32, #tpu.memory_space<vmem>>, %arg7: memref<32x16xf32, #tpu.memory_space<vmem>>, %arg8: memref<1x16xf32, #tpu.memory_space<vmem>>, %arg9: memref<16x128xf32, #tpu.memory_space<vmem>>, %arg10: memref<1x128xf32, #tpu.memory_space<vmem>>, %arg11: memref<8x128xf32, #tpu.memory_space<vmem>>) attributes {dimension_semantics = [#tpu.dimension_semantics<parallel>], iteration_bounds = array<i64: 1>, scalar_prefetch = 0 : i64, scratch_operands = 0 : i64, tpu.core_type = #tpu.core_type<tc>, window_params = [{transform_indices = @transform_0, window_bounds = array<i64: 8, 8>}, {pipeline_mode = #tpu.pipeline_mode<synchronous>, transform_indices = @transform_1, window_bounds = array<i64: 1, 128>}, {pipeline_mode = #tpu.pipeline_mode<synchronous>, transform_indices = @transform_2, window_bounds = array<i64: 32, 128>}, {pipeline_mode = #tpu.pipeline_mode<synchronous>, transform_indices = @transform_3, window_bounds = array<i64: 1, 128>}, {pipeline_mode = #tpu.pipeline_mode<synchronous>, transform_indices = @transform_4, window_bounds = array<i64: 256, 32>}, {pipeline_mode = #tpu.pipeline_mode<synchronous>, transform_indices = @transform_5, window_bounds = array<i64: 1, 32>}, {pipeline_mode = #tpu.pipeline_mode<synchronous>, transform_indices = @transform_6, window_bounds = array<i64: 32, 16>}, {pipeline_mode = #tpu.pipeline_mode<synchronous>, transform_indices = @transform_7, window_bounds = array<i64: 1, 16>}, {pipeline_mode = #tpu.pipeline_mode<synchronous>, transform_indices = @transform_8, window_bounds = array<i64: 16, 128>}, {pipeline_mode = #tpu.pipeline_mode<synchronous>, transform_indices = @transform_9, window_bounds = array<i64: 1, 128>}, {transform_indices = @transform_10, window_bounds = array<i64: 8, 128>}]} {
    %c0 = arith.constant 0 : index
    %c0_0 = arith.constant 0 : index
    %0 = vector.load %arg1[%c0, %c0_0] : memref<8x8xf32, #tpu.memory_space<vmem>>, vector<8x8xf32>
    %c0_1 = arith.constant 0 : index
    %c0_2 = arith.constant 0 : index
    %1 = vector.load %arg2[%c0_1, %c0_2] : memref<1x128xf32, #tpu.memory_space<vmem>>, vector<1x128xf32>
    %c0_3 = arith.constant 0 : index
    %c0_4 = arith.constant 0 : index
    %2 = vector.load %arg4[%c0_3, %c0_4] : memref<1x128xf32, #tpu.memory_space<vmem>>, vector<1x128xf32>
    %c0_5 = arith.constant 0 : index
    %c0_6 = arith.constant 0 : index
    %3 = vector.load %arg3[%c0_5, %c0_6] : memref<32x128xf32, #tpu.memory_space<vmem>>, vector<32x128xf32>
    %cst = arith.constant 0.000000e+00 : f32
    %4 = vector.broadcast %cst : f32 to vector<8x32xf32>
    %cst_7 = arith.constant 0.000000e+00 : f32
    %5 = vector.broadcast %cst_7 : f32 to vector<8x32xf32>
    %cst_8 = arith.constant 0.000000e+00 : f32
    %6 = vector.broadcast %cst_8 : f32 to vector<8x32xf32>
    %7 = vector.extract_strided_slice %0 {offsets = [0, 0], sizes = [8, 1], strides = [1, 1]} : vector<8x8xf32> to vector<8x1xf32>
    %8 = vector.broadcast %7 : vector<8x1xf32> to vector<8x128xf32>
    %9 = vector.broadcast %1 : vector<1x128xf32> to vector<8x128xf32>
    %10 = arith.mulf %8, %9 : vector<8x128xf32>
    %11 = vector.broadcast %2 : vector<1x128xf32> to vector<8x128xf32>
    %12 = arith.addf %10, %11 : vector<8x128xf32>
    %cst_9 = arith.constant dense<0.000000e+00> : vector<8x128xf32>
    %13 = tpu.matmul %4, %3, %cst_9 {dimension_numbers = #tpu.dot_dimension_numbers<[1], [0], [0], [1], [0, 0, 1, 1], [], []>} : vector<8x32xf32>, vector<32x128xf32>, vector<8x128xf32> -> vector<8x128xf32>
    %14 = arith.addf %12, %13 : vector<8x128xf32>
    %15 = vector.extract_strided_slice %14 {offsets = [0, 0], sizes = [8, 96], strides = [1, 1]} : vector<8x128xf32> to vector<8x96xf32>
    %16 = arith.negf %15 : vector<8x96xf32>
    %17 = math.exp %16 : vector<8x96xf32>
    %cst_10 = arith.constant 1.000000e+00 : f32
    %18 = vector.broadcast %cst_10 : f32 to vector<8x96xf32>
    %19 = arith.addf %18, %17 : vector<8x96xf32>
    %20 = arith.divf %18, %19 : vector<8x96xf32>
    %21 = vector.extract_strided_slice %14 {offsets = [0, 96], sizes = [8, 32], strides = [1, 1]} : vector<8x128xf32> to vector<8x32xf32>
    %22 = math.tanh %21 : vector<8x32xf32>
    %23 = vector.extract_strided_slice %20 {offsets = [0, 0], sizes = [8, 32], strides = [1, 1]} : vector<8x96xf32> to vector<8x32xf32>
    %24 = vector.extract_strided_slice %20 {offsets = [0, 32], sizes = [8, 32], strides = [1, 1]} : vector<8x96xf32> to vector<8x32xf32>
    %25 = vector.extract_strided_slice %20 {offsets = [0, 64], sizes = [8, 32], strides = [1, 1]} : vector<8x96xf32> to vector<8x32xf32>
    %26 = arith.mulf %24, %5 : vector<8x32xf32>
    %27 = arith.mulf %23, %22 : vector<8x32xf32>
    %28 = arith.addf %26, %27 : vector<8x32xf32>
    %29 = math.tanh %28 : vector<8x32xf32>
    %30 = arith.mulf %25, %29 : vector<8x32xf32>
    %c0_11 = arith.constant 0 : index
    %c0_12 = arith.constant 0 : index
    %31 = vector.load %arg5[%c0_11, %c0_12] : memref<256x32xf32, #tpu.memory_space<vmem>>, vector<32x32xf32>
    %cst_13 = arith.constant dense<0.000000e+00> : vector<8x32xf32>
    %32 = tpu.matmul %30, %31, %cst_13 {dimension_numbers = #tpu.dot_dimension_numbers<[1], [0], [0], [1], [0, 0, 1, 1], [], []>} : vector<8x32xf32>, vector<32x32xf32>, vector<8x32xf32> -> vector<8x32xf32>
    %33 = arith.addf %6, %32 : vector<8x32xf32>
    %34 = vector.extract_strided_slice %0 {offsets = [0, 1], sizes = [8, 1], strides = [1, 1]} : vector<8x8xf32> to vector<8x1xf32>
    %35 = vector.broadcast %34 : vector<8x1xf32> to vector<8x128xf32>
    %36 = vector.broadcast %1 : vector<1x128xf32> to vector<8x128xf32>
    %37 = arith.mulf %35, %36 : vector<8x128xf32>
    %38 = vector.broadcast %2 : vector<1x128xf32> to vector<8x128xf32>
    %39 = arith.addf %37, %38 : vector<8x128xf32>
    %cst_14 = arith.constant dense<0.000000e+00> : vector<8x128xf32>
    %40 = tpu.matmul %30, %3, %cst_14 {dimension_numbers = #tpu.dot_dimension_numbers<[1], [0], [0], [1], [0, 0, 1, 1], [], []>} : vector<8x32xf32>, vector<32x128xf32>, vector<8x128xf32> -> vector<8x128xf32>
    %41 = arith.addf %39, %40 : vector<8x128xf32>
    %42 = vector.extract_strided_slice %41 {offsets = [0, 0], sizes = [8, 96], strides = [1, 1]} : vector<8x128xf32> to vector<8x96xf32>
    %43 = arith.negf %42 : vector<8x96xf32>
    %44 = math.exp %43 : vector<8x96xf32>
    %cst_15 = arith.constant 1.000000e+00 : f32
    %45 = vector.broadcast %cst_15 : f32 to vector<8x96xf32>
    %46 = arith.addf %45, %44 : vector<8x96xf32>
    %47 = arith.divf %45, %46 : vector<8x96xf32>
    %48 = vector.extract_strided_slice %41 {offsets = [0, 96], sizes = [8, 32], strides = [1, 1]} : vector<8x128xf32> to vector<8x32xf32>
    %49 = math.tanh %48 : vector<8x32xf32>
    %50 = vector.extract_strided_slice %47 {offsets = [0, 0], sizes = [8, 32], strides = [1, 1]} : vector<8x96xf32> to vector<8x32xf32>
    %51 = vector.extract_strided_slice %47 {offsets = [0, 32], sizes = [8, 32], strides = [1, 1]} : vector<8x96xf32> to vector<8x32xf32>
    %52 = vector.extract_strided_slice %47 {offsets = [0, 64], sizes = [8, 32], strides = [1, 1]} : vector<8x96xf32> to vector<8x32xf32>
    %53 = arith.mulf %51, %28 : vector<8x32xf32>
    %54 = arith.mulf %50, %49 : vector<8x32xf32>
    %55 = arith.addf %53, %54 : vector<8x32xf32>
    %56 = math.tanh %55 : vector<8x32xf32>
    %57 = arith.mulf %52, %56 : vector<8x32xf32>
    %c32 = arith.constant 32 : index
    %c0_16 = arith.constant 0 : index
    %58 = vector.load %arg5[%c32, %c0_16] : memref<256x32xf32, #tpu.memory_space<vmem>>, vector<32x32xf32>
    %cst_17 = arith.constant dense<0.000000e+00> : vector<8x32xf32>
    %59 = tpu.matmul %57, %58, %cst_17 {dimension_numbers = #tpu.dot_dimension_numbers<[1], [0], [0], [1], [0, 0, 1, 1], [], []>} : vector<8x32xf32>, vector<32x32xf32>, vector<8x32xf32> -> vector<8x32xf32>
    %60 = arith.addf %33, %59 : vector<8x32xf32>
    %61 = vector.extract_strided_slice %0 {offsets = [0, 2], sizes = [8, 1], strides = [1, 1]} : vector<8x8xf32> to vector<8x1xf32>
    %62 = vector.broadcast %61 : vector<8x1xf32> to vector<8x128xf32>
    %63 = vector.broadcast %1 : vector<1x128xf32> to vector<8x128xf32>
    %64 = arith.mulf %62, %63 : vector<8x128xf32>
    %65 = vector.broadcast %2 : vector<1x128xf32> to vector<8x128xf32>
    %66 = arith.addf %64, %65 : vector<8x128xf32>
    %cst_18 = arith.constant dense<0.000000e+00> : vector<8x128xf32>
    %67 = tpu.matmul %57, %3, %cst_18 {dimension_numbers = #tpu.dot_dimension_numbers<[1], [0], [0], [1], [0, 0, 1, 1], [], []>} : vector<8x32xf32>, vector<32x128xf32>, vector<8x128xf32> -> vector<8x128xf32>
    %68 = arith.addf %66, %67 : vector<8x128xf32>
    %69 = vector.extract_strided_slice %68 {offsets = [0, 0], sizes = [8, 96], strides = [1, 1]} : vector<8x128xf32> to vector<8x96xf32>
    %70 = arith.negf %69 : vector<8x96xf32>
    %71 = math.exp %70 : vector<8x96xf32>
    %cst_19 = arith.constant 1.000000e+00 : f32
    %72 = vector.broadcast %cst_19 : f32 to vector<8x96xf32>
    %73 = arith.addf %72, %71 : vector<8x96xf32>
    %74 = arith.divf %72, %73 : vector<8x96xf32>
    %75 = vector.extract_strided_slice %68 {offsets = [0, 96], sizes = [8, 32], strides = [1, 1]} : vector<8x128xf32> to vector<8x32xf32>
    %76 = math.tanh %75 : vector<8x32xf32>
    %77 = vector.extract_strided_slice %74 {offsets = [0, 0], sizes = [8, 32], strides = [1, 1]} : vector<8x96xf32> to vector<8x32xf32>
    %78 = vector.extract_strided_slice %74 {offsets = [0, 32], sizes = [8, 32], strides = [1, 1]} : vector<8x96xf32> to vector<8x32xf32>
    %79 = vector.extract_strided_slice %74 {offsets = [0, 64], sizes = [8, 32], strides = [1, 1]} : vector<8x96xf32> to vector<8x32xf32>
    %80 = arith.mulf %78, %55 : vector<8x32xf32>
    %81 = arith.mulf %77, %76 : vector<8x32xf32>
    %82 = arith.addf %80, %81 : vector<8x32xf32>
    %83 = math.tanh %82 : vector<8x32xf32>
    %84 = arith.mulf %79, %83 : vector<8x32xf32>
    %c64 = arith.constant 64 : index
    %c0_20 = arith.constant 0 : index
    %85 = vector.load %arg5[%c64, %c0_20] : memref<256x32xf32, #tpu.memory_space<vmem>>, vector<32x32xf32>
    %cst_21 = arith.constant dense<0.000000e+00> : vector<8x32xf32>
    %86 = tpu.matmul %84, %85, %cst_21 {dimension_numbers = #tpu.dot_dimension_numbers<[1], [0], [0], [1], [0, 0, 1, 1], [], []>} : vector<8x32xf32>, vector<32x32xf32>, vector<8x32xf32> -> vector<8x32xf32>
    %87 = arith.addf %60, %86 : vector<8x32xf32>
    %88 = vector.extract_strided_slice %0 {offsets = [0, 3], sizes = [8, 1], strides = [1, 1]} : vector<8x8xf32> to vector<8x1xf32>
    %89 = vector.broadcast %88 : vector<8x1xf32> to vector<8x128xf32>
    %90 = vector.broadcast %1 : vector<1x128xf32> to vector<8x128xf32>
    %91 = arith.mulf %89, %90 : vector<8x128xf32>
    %92 = vector.broadcast %2 : vector<1x128xf32> to vector<8x128xf32>
    %93 = arith.addf %91, %92 : vector<8x128xf32>
    %cst_22 = arith.constant dense<0.000000e+00> : vector<8x128xf32>
    %94 = tpu.matmul %84, %3, %cst_22 {dimension_numbers = #tpu.dot_dimension_numbers<[1], [0], [0], [1], [0, 0, 1, 1], [], []>} : vector<8x32xf32>, vector<32x128xf32>, vector<8x128xf32> -> vector<8x128xf32>
    %95 = arith.addf %93, %94 : vector<8x128xf32>
    %96 = vector.extract_strided_slice %95 {offsets = [0, 0], sizes = [8, 96], strides = [1, 1]} : vector<8x128xf32> to vector<8x96xf32>
    %97 = arith.negf %96 : vector<8x96xf32>
    %98 = math.exp %97 : vector<8x96xf32>
    %cst_23 = arith.constant 1.000000e+00 : f32
    %99 = vector.broadcast %cst_23 : f32 to vector<8x96xf32>
    %100 = arith.addf %99, %98 : vector<8x96xf32>
    %101 = arith.divf %99, %100 : vector<8x96xf32>
    %102 = vector.extract_strided_slice %95 {offsets = [0, 96], sizes = [8, 32], strides = [1, 1]} : vector<8x128xf32> to vector<8x32xf32>
    %103 = math.tanh %102 : vector<8x32xf32>
    %104 = vector.extract_strided_slice %101 {offsets = [0, 0], sizes = [8, 32], strides = [1, 1]} : vector<8x96xf32> to vector<8x32xf32>
    %105 = vector.extract_strided_slice %101 {offsets = [0, 32], sizes = [8, 32], strides = [1, 1]} : vector<8x96xf32> to vector<8x32xf32>
    %106 = vector.extract_strided_slice %101 {offsets = [0, 64], sizes = [8, 32], strides = [1, 1]} : vector<8x96xf32> to vector<8x32xf32>
    %107 = arith.mulf %105, %82 : vector<8x32xf32>
    %108 = arith.mulf %104, %103 : vector<8x32xf32>
    %109 = arith.addf %107, %108 : vector<8x32xf32>
    %110 = math.tanh %109 : vector<8x32xf32>
    %111 = arith.mulf %106, %110 : vector<8x32xf32>
    %c96 = arith.constant 96 : index
    %c0_24 = arith.constant 0 : index
    %112 = vector.load %arg5[%c96, %c0_24] : memref<256x32xf32, #tpu.memory_space<vmem>>, vector<32x32xf32>
    %cst_25 = arith.constant dense<0.000000e+00> : vector<8x32xf32>
    %113 = tpu.matmul %111, %112, %cst_25 {dimension_numbers = #tpu.dot_dimension_numbers<[1], [0], [0], [1], [0, 0, 1, 1], [], []>} : vector<8x32xf32>, vector<32x32xf32>, vector<8x32xf32> -> vector<8x32xf32>
    %114 = arith.addf %87, %113 : vector<8x32xf32>
    %115 = vector.extract_strided_slice %0 {offsets = [0, 4], sizes = [8, 1], strides = [1, 1]} : vector<8x8xf32> to vector<8x1xf32>
    %116 = vector.broadcast %115 : vector<8x1xf32> to vector<8x128xf32>
    %117 = vector.broadcast %1 : vector<1x128xf32> to vector<8x128xf32>
    %118 = arith.mulf %116, %117 : vector<8x128xf32>
    %119 = vector.broadcast %2 : vector<1x128xf32> to vector<8x128xf32>
    %120 = arith.addf %118, %119 : vector<8x128xf32>
    %cst_26 = arith.constant dense<0.000000e+00> : vector<8x128xf32>
    %121 = tpu.matmul %111, %3, %cst_26 {dimension_numbers = #tpu.dot_dimension_numbers<[1], [0], [0], [1], [0, 0, 1, 1], [], []>} : vector<8x32xf32>, vector<32x128xf32>, vector<8x128xf32> -> vector<8x128xf32>
    %122 = arith.addf %120, %121 : vector<8x128xf32>
    %123 = vector.extract_strided_slice %122 {offsets = [0, 0], sizes = [8, 96], strides = [1, 1]} : vector<8x128xf32> to vector<8x96xf32>
    %124 = arith.negf %123 : vector<8x96xf32>
    %125 = math.exp %124 : vector<8x96xf32>
    %cst_27 = arith.constant 1.000000e+00 : f32
    %126 = vector.broadcast %cst_27 : f32 to vector<8x96xf32>
    %127 = arith.addf %126, %125 : vector<8x96xf32>
    %128 = arith.divf %126, %127 : vector<8x96xf32>
    %129 = vector.extract_strided_slice %122 {offsets = [0, 96], sizes = [8, 32], strides = [1, 1]} : vector<8x128xf32> to vector<8x32xf32>
    %130 = math.tanh %129 : vector<8x32xf32>
    %131 = vector.extract_strided_slice %128 {offsets = [0, 0], sizes = [8, 32], strides = [1, 1]} : vector<8x96xf32> to vector<8x32xf32>
    %132 = vector.extract_strided_slice %128 {offsets = [0, 32], sizes = [8, 32], strides = [1, 1]} : vector<8x96xf32> to vector<8x32xf32>
    %133 = vector.extract_strided_slice %128 {offsets = [0, 64], sizes = [8, 32], strides = [1, 1]} : vector<8x96xf32> to vector<8x32xf32>
    %134 = arith.mulf %132, %109 : vector<8x32xf32>
    %135 = arith.mulf %131, %130 : vector<8x32xf32>
    %136 = arith.addf %134, %135 : vector<8x32xf32>
    %137 = math.tanh %136 : vector<8x32xf32>
    %138 = arith.mulf %133, %137 : vector<8x32xf32>
    %c128 = arith.constant 128 : index
    %c0_28 = arith.constant 0 : index
    %139 = vector.load %arg5[%c128, %c0_28] : memref<256x32xf32, #tpu.memory_space<vmem>>, vector<32x32xf32>
    %cst_29 = arith.constant dense<0.000000e+00> : vector<8x32xf32>
    %140 = tpu.matmul %138, %139, %cst_29 {dimension_numbers = #tpu.dot_dimension_numbers<[1], [0], [0], [1], [0, 0, 1, 1], [], []>} : vector<8x32xf32>, vector<32x32xf32>, vector<8x32xf32> -> vector<8x32xf32>
    %141 = arith.addf %114, %140 : vector<8x32xf32>
    %142 = vector.extract_strided_slice %0 {offsets = [0, 5], sizes = [8, 1], strides = [1, 1]} : vector<8x8xf32> to vector<8x1xf32>
    %143 = vector.broadcast %142 : vector<8x1xf32> to vector<8x128xf32>
    %144 = vector.broadcast %1 : vector<1x128xf32> to vector<8x128xf32>
    %145 = arith.mulf %143, %144 : vector<8x128xf32>
    %146 = vector.broadcast %2 : vector<1x128xf32> to vector<8x128xf32>
    %147 = arith.addf %145, %146 : vector<8x128xf32>
    %cst_30 = arith.constant dense<0.000000e+00> : vector<8x128xf32>
    %148 = tpu.matmul %138, %3, %cst_30 {dimension_numbers = #tpu.dot_dimension_numbers<[1], [0], [0], [1], [0, 0, 1, 1], [], []>} : vector<8x32xf32>, vector<32x128xf32>, vector<8x128xf32> -> vector<8x128xf32>
    %149 = arith.addf %147, %148 : vector<8x128xf32>
    %150 = vector.extract_strided_slice %149 {offsets = [0, 0], sizes = [8, 96], strides = [1, 1]} : vector<8x128xf32> to vector<8x96xf32>
    %151 = arith.negf %150 : vector<8x96xf32>
    %152 = math.exp %151 : vector<8x96xf32>
    %cst_31 = arith.constant 1.000000e+00 : f32
    %153 = vector.broadcast %cst_31 : f32 to vector<8x96xf32>
    %154 = arith.addf %153, %152 : vector<8x96xf32>
    %155 = arith.divf %153, %154 : vector<8x96xf32>
    %156 = vector.extract_strided_slice %149 {offsets = [0, 96], sizes = [8, 32], strides = [1, 1]} : vector<8x128xf32> to vector<8x32xf32>
    %157 = math.tanh %156 : vector<8x32xf32>
    %158 = vector.extract_strided_slice %155 {offsets = [0, 0], sizes = [8, 32], strides = [1, 1]} : vector<8x96xf32> to vector<8x32xf32>
    %159 = vector.extract_strided_slice %155 {offsets = [0, 32], sizes = [8, 32], strides = [1, 1]} : vector<8x96xf32> to vector<8x32xf32>
    %160 = vector.extract_strided_slice %155 {offsets = [0, 64], sizes = [8, 32], strides = [1, 1]} : vector<8x96xf32> to vector<8x32xf32>
    %161 = arith.mulf %159, %136 : vector<8x32xf32>
    %162 = arith.mulf %158, %157 : vector<8x32xf32>
    %163 = arith.addf %161, %162 : vector<8x32xf32>
    %164 = math.tanh %163 : vector<8x32xf32>
    %165 = arith.mulf %160, %164 : vector<8x32xf32>
    %c160 = arith.constant 160 : index
    %c0_32 = arith.constant 0 : index
    %166 = vector.load %arg5[%c160, %c0_32] : memref<256x32xf32, #tpu.memory_space<vmem>>, vector<32x32xf32>
    %cst_33 = arith.constant dense<0.000000e+00> : vector<8x32xf32>
    %167 = tpu.matmul %165, %166, %cst_33 {dimension_numbers = #tpu.dot_dimension_numbers<[1], [0], [0], [1], [0, 0, 1, 1], [], []>} : vector<8x32xf32>, vector<32x32xf32>, vector<8x32xf32> -> vector<8x32xf32>
    %168 = arith.addf %141, %167 : vector<8x32xf32>
    %169 = vector.extract_strided_slice %0 {offsets = [0, 6], sizes = [8, 1], strides = [1, 1]} : vector<8x8xf32> to vector<8x1xf32>
    %170 = vector.broadcast %169 : vector<8x1xf32> to vector<8x128xf32>
    %171 = vector.broadcast %1 : vector<1x128xf32> to vector<8x128xf32>
    %172 = arith.mulf %170, %171 : vector<8x128xf32>
    %173 = vector.broadcast %2 : vector<1x128xf32> to vector<8x128xf32>
    %174 = arith.addf %172, %173 : vector<8x128xf32>
    %cst_34 = arith.constant dense<0.000000e+00> : vector<8x128xf32>
    %175 = tpu.matmul %165, %3, %cst_34 {dimension_numbers = #tpu.dot_dimension_numbers<[1], [0], [0], [1], [0, 0, 1, 1], [], []>} : vector<8x32xf32>, vector<32x128xf32>, vector<8x128xf32> -> vector<8x128xf32>
    %176 = arith.addf %174, %175 : vector<8x128xf32>
    %177 = vector.extract_strided_slice %176 {offsets = [0, 0], sizes = [8, 96], strides = [1, 1]} : vector<8x128xf32> to vector<8x96xf32>
    %178 = arith.negf %177 : vector<8x96xf32>
    %179 = math.exp %178 : vector<8x96xf32>
    %cst_35 = arith.constant 1.000000e+00 : f32
    %180 = vector.broadcast %cst_35 : f32 to vector<8x96xf32>
    %181 = arith.addf %180, %179 : vector<8x96xf32>
    %182 = arith.divf %180, %181 : vector<8x96xf32>
    %183 = vector.extract_strided_slice %176 {offsets = [0, 96], sizes = [8, 32], strides = [1, 1]} : vector<8x128xf32> to vector<8x32xf32>
    %184 = math.tanh %183 : vector<8x32xf32>
    %185 = vector.extract_strided_slice %182 {offsets = [0, 0], sizes = [8, 32], strides = [1, 1]} : vector<8x96xf32> to vector<8x32xf32>
    %186 = vector.extract_strided_slice %182 {offsets = [0, 32], sizes = [8, 32], strides = [1, 1]} : vector<8x96xf32> to vector<8x32xf32>
    %187 = vector.extract_strided_slice %182 {offsets = [0, 64], sizes = [8, 32], strides = [1, 1]} : vector<8x96xf32> to vector<8x32xf32>
    %188 = arith.mulf %186, %163 : vector<8x32xf32>
    %189 = arith.mulf %185, %184 : vector<8x32xf32>
    %190 = arith.addf %188, %189 : vector<8x32xf32>
    %191 = math.tanh %190 : vector<8x32xf32>
    %192 = arith.mulf %187, %191 : vector<8x32xf32>
    %c192 = arith.constant 192 : index
    %c0_36 = arith.constant 0 : index
    %193 = vector.load %arg5[%c192, %c0_36] : memref<256x32xf32, #tpu.memory_space<vmem>>, vector<32x32xf32>
    %cst_37 = arith.constant dense<0.000000e+00> : vector<8x32xf32>
    %194 = tpu.matmul %192, %193, %cst_37 {dimension_numbers = #tpu.dot_dimension_numbers<[1], [0], [0], [1], [0, 0, 1, 1], [], []>} : vector<8x32xf32>, vector<32x32xf32>, vector<8x32xf32> -> vector<8x32xf32>
    %195 = arith.addf %168, %194 : vector<8x32xf32>
    %196 = vector.extract_strided_slice %0 {offsets = [0, 7], sizes = [8, 1], strides = [1, 1]} : vector<8x8xf32> to vector<8x1xf32>
    %197 = vector.broadcast %196 : vector<8x1xf32> to vector<8x128xf32>
    %198 = vector.broadcast %1 : vector<1x128xf32> to vector<8x128xf32>
    %199 = arith.mulf %197, %198 : vector<8x128xf32>
    %200 = vector.broadcast %2 : vector<1x128xf32> to vector<8x128xf32>
    %201 = arith.addf %199, %200 : vector<8x128xf32>
    %cst_38 = arith.constant dense<0.000000e+00> : vector<8x128xf32>
    %202 = tpu.matmul %192, %3, %cst_38 {dimension_numbers = #tpu.dot_dimension_numbers<[1], [0], [0], [1], [0, 0, 1, 1], [], []>} : vector<8x32xf32>, vector<32x128xf32>, vector<8x128xf32> -> vector<8x128xf32>
    %203 = arith.addf %201, %202 : vector<8x128xf32>
    %204 = vector.extract_strided_slice %203 {offsets = [0, 0], sizes = [8, 96], strides = [1, 1]} : vector<8x128xf32> to vector<8x96xf32>
    %205 = arith.negf %204 : vector<8x96xf32>
    %206 = math.exp %205 : vector<8x96xf32>
    %cst_39 = arith.constant 1.000000e+00 : f32
    %207 = vector.broadcast %cst_39 : f32 to vector<8x96xf32>
    %208 = arith.addf %207, %206 : vector<8x96xf32>
    %209 = arith.divf %207, %208 : vector<8x96xf32>
    %210 = vector.extract_strided_slice %203 {offsets = [0, 96], sizes = [8, 32], strides = [1, 1]} : vector<8x128xf32> to vector<8x32xf32>
    %211 = math.tanh %210 : vector<8x32xf32>
    %212 = vector.extract_strided_slice %209 {offsets = [0, 0], sizes = [8, 32], strides = [1, 1]} : vector<8x96xf32> to vector<8x32xf32>
    %213 = vector.extract_strided_slice %209 {offsets = [0, 32], sizes = [8, 32], strides = [1, 1]} : vector<8x96xf32> to vector<8x32xf32>
    %214 = vector.extract_strided_slice %209 {offsets = [0, 64], sizes = [8, 32], strides = [1, 1]} : vector<8x96xf32> to vector<8x32xf32>
    %215 = arith.mulf %213, %190 : vector<8x32xf32>
    %216 = arith.mulf %212, %211 : vector<8x32xf32>
    %217 = arith.addf %215, %216 : vector<8x32xf32>
    %218 = math.tanh %217 : vector<8x32xf32>
    %219 = arith.mulf %214, %218 : vector<8x32xf32>
    %c224 = arith.constant 224 : index
    %c0_40 = arith.constant 0 : index
    %220 = vector.load %arg5[%c224, %c0_40] : memref<256x32xf32, #tpu.memory_space<vmem>>, vector<32x32xf32>
    %cst_41 = arith.constant dense<0.000000e+00> : vector<8x32xf32>
    %221 = tpu.matmul %219, %220, %cst_41 {dimension_numbers = #tpu.dot_dimension_numbers<[1], [0], [0], [1], [0, 0, 1, 1], [], []>} : vector<8x32xf32>, vector<32x32xf32>, vector<8x32xf32> -> vector<8x32xf32>
    %222 = arith.addf %195, %221 : vector<8x32xf32>
    %c0_42 = arith.constant 0 : index
    %c0_43 = arith.constant 0 : index
    %223 = vector.load %arg6[%c0_42, %c0_43] : memref<1x32xf32, #tpu.memory_space<vmem>>, vector<1x32xf32>
    %224 = vector.broadcast %223 : vector<1x32xf32> to vector<8x32xf32>
    %225 = arith.addf %222, %224 : vector<8x32xf32>
    %cst_44 = arith.constant 0.000000e+00 : f32
    %226 = vector.broadcast %cst_44 : f32 to vector<8x32xf32>
    %227 = arith.maximumf %225, %226 : vector<8x32xf32>
    %c0_45 = arith.constant 0 : index
    %c0_46 = arith.constant 0 : index
    %228 = vector.load %arg7[%c0_45, %c0_46] : memref<32x16xf32, #tpu.memory_space<vmem>>, vector<32x16xf32>
    %cst_47 = arith.constant dense<0.000000e+00> : vector<8x16xf32>
    %229 = tpu.matmul %227, %228, %cst_47 {dimension_numbers = #tpu.dot_dimension_numbers<[1], [0], [0], [1], [0, 0, 1, 1], [], []>} : vector<8x32xf32>, vector<32x16xf32>, vector<8x16xf32> -> vector<8x16xf32>
    %c0_48 = arith.constant 0 : index
    %c0_49 = arith.constant 0 : index
    %230 = vector.load %arg8[%c0_48, %c0_49] : memref<1x16xf32, #tpu.memory_space<vmem>>, vector<1x16xf32>
    %231 = vector.broadcast %230 : vector<1x16xf32> to vector<8x16xf32>
    %232 = arith.addf %229, %231 : vector<8x16xf32>
    %c0_50 = arith.constant 0 : index
    %c0_51 = arith.constant 0 : index
    %233 = vector.load %arg9[%c0_50, %c0_51] : memref<16x128xf32, #tpu.memory_space<vmem>>, vector<16x128xf32>
    %cst_52 = arith.constant dense<0.000000e+00> : vector<8x128xf32>
    %234 = tpu.matmul %232, %233, %cst_52 {dimension_numbers = #tpu.dot_dimension_numbers<[1], [0], [0], [1], [0, 0, 1, 1], [], []>} : vector<8x16xf32>, vector<16x128xf32>, vector<8x128xf32> -> vector<8x128xf32>
    %c0_53 = arith.constant 0 : index
    %c0_54 = arith.constant 0 : index
    %235 = vector.load %arg10[%c0_53, %c0_54] : memref<1x128xf32, #tpu.memory_space<vmem>>, vector<1x128xf32>
    %236 = vector.broadcast %235 : vector<1x128xf32> to vector<8x128xf32>
    %237 = arith.addf %234, %236 : vector<8x128xf32>
    %cst_55 = arith.constant dense<0xFF800000> : vector<8xf32>
    %238 = vector.multi_reduction <maximumf>, %237, %cst_55 [1] : vector<8x128xf32> to vector<8xf32>
    %239 = vector.shape_cast %238 : vector<8xf32> to vector<8x1xf32>
    %240 = vector.broadcast %239 : vector<8x1xf32> to vector<8x128xf32>
    %241 = arith.subf %237, %240 : vector<8x128xf32>
    %242 = math.exp %241 : vector<8x128xf32>
    %cst_56 = arith.constant dense<0.000000e+00> : vector<8xf32>
    %243 = vector.multi_reduction <add>, %242, %cst_56 [1] : vector<8x128xf32> to vector<8xf32>
    %244 = vector.shape_cast %243 : vector<8xf32> to vector<8x1xf32>
    %245 = math.log %244 : vector<8x1xf32>
    %246 = arith.addf %239, %245 : vector<8x1xf32>
    %247 = vector.broadcast %246 : vector<8x1xf32> to vector<8x128xf32>
    %248 = arith.subf %237, %247 : vector<8x128xf32>
    %c0_57 = arith.constant 0 : index
    %c0_58 = arith.constant 0 : index
    %249 = vector.load %arg11[%c0_57, %c0_58] : memref<8x128xf32, #tpu.memory_space<vmem>>, vector<8x128xf32>
    tpu.vector_store %arg11[%c0_57, %c0_58], %248 {strides = array<i32>} : memref<8x128xf32, #tpu.memory_space<vmem>>, vector<8x128xf32>,
    return
  }
  func.func @transform_0(%arg0: i32) -> (i32, i32) {
    %c0_i32 = arith.constant 0 : i32
    %c0_i32_0 = arith.constant 0 : i32
    return %arg0, %c0_i32 : i32, i32
  }
  func.func @transform_1(%arg0: i32) -> (i32, i32) {
    %c0_i32 = arith.constant 0 : i32
    %c0_i32_0 = arith.constant 0 : i32
    %c0_i32_1 = arith.constant 0 : i32
    return %c0_i32, %c0_i32_0 : i32, i32
  }
  func.func @transform_2(%arg0: i32) -> (i32, i32) {
    %c0_i32 = arith.constant 0 : i32
    %c0_i32_0 = arith.constant 0 : i32
    %c0_i32_1 = arith.constant 0 : i32
    return %c0_i32, %c0_i32_0 : i32, i32
  }
  func.func @transform_3(%arg0: i32) -> (i32, i32) {
    %c0_i32 = arith.constant 0 : i32
    %c0_i32_0 = arith.constant 0 : i32
    %c0_i32_1 = arith.constant 0 : i32
    return %c0_i32, %c0_i32_0 : i32, i32
  }
  func.func @transform_4(%arg0: i32) -> (i32, i32) {
    %c0_i32 = arith.constant 0 : i32
    %c0_i32_0 = arith.constant 0 : i32
    %c0_i32_1 = arith.constant 0 : i32
    return %c0_i32, %c0_i32_0 : i32, i32
  }
  func.func @transform_5(%arg0: i32) -> (i32, i32) {
    %c0_i32 = arith.constant 0 : i32
    %c0_i32_0 = arith.constant 0 : i32
    %c0_i32_1 = arith.constant 0 : i32
    return %c0_i32, %c0_i32_0 : i32, i32
  }
  func.func @transform_6(%arg0: i32) -> (i32, i32) {
    %c0_i32 = arith.constant 0 : i32
    %c0_i32_0 = arith.constant 0 : i32
    %c0_i32_1 = arith.constant 0 : i32
    return %c0_i32, %c0_i32_0 : i32, i32
  }
  func.func @transform_7(%arg0: i32) -> (i32, i32) {
    %c0_i32 = arith.constant 0 : i32
    %c0_i32_0 = arith.constant 0 : i32
    %c0_i32_1 = arith.constant 0 : i32
    return %c0_i32, %c0_i32_0 : i32, i32
  }
  func.func @transform_8(%arg0: i32) -> (i32, i32) {
    %c0_i32 = arith.constant 0 : i32
    %c0_i32_0 = arith.constant 0 : i32
    %c0_i32_1 = arith.constant 0 : i32
    return %c0_i32, %c0_i32_0 : i32, i32
  }
  func.func @transform_9(%arg0: i32) -> (i32, i32) {
    %c0_i32 = arith.constant 0 : i32
    %c0_i32_0 = arith.constant 0 : i32
    %c0_i32_1 = arith.constant 0 : i32
    return %c0_i32, %c0_i32_0 : i32, i32
  }
  func.func @transform_10(%arg0: i32) -> (i32, i32) {
    %c0_i32 = arith.constant 0 : i32
    %c0_i32_0 = arith.constant 0 : i32
    return %arg0, %c0_i32 : i32, i32
  }
}

</mosaic_0001>

<bundles_post_ra>
// kernel: tpu_custom_call.1
= control target key start
LH: loop header
LB: loop body
LE: loop exit
PB: predicated region body
PF: predicated region fallthrough
CT: control target
= control target key end

     0   :  { %v2131_v1 = vmov 0.0   ;;  %vm2132_vm0 = vmmov 0   ;;  %v2133_v4 = vmov 0   ;;  %s2578_s0 = inlined_call_operand.vmem [shape: f32[8,8], index: 0, kind: input, shape index: {}]   ;;  %s2579_s1 = inlined_call_operand.vmem [shape: f32[1,128], index: 1, kind: input, shape index: {}]   ;;  %s2580_s2 = inlined_call_operand.vmem [shape: f32[32,128], index: 2, kind: input, shape index: {}]   ;;  %s2581_s3 = inlined_call_operand.vmem [shape: f32[1,128], index: 3, kind: input, shape index: {}]   ;;  %s2582_s4 = inlined_call_operand.vmem [shape: f32[256,32], index: 4, kind: input, shape index: {}]   ;;  %s2583_s5 = inlined_call_operand.vmem [shape: f32[1,32], index: 5, kind: input, shape index: {}]   ;;  %s2584_s6 = inlined_call_operand.vmem [shape: f32[32,16], index: 6, kind: input, shape index: {}]   ;;  %s2585_s7 = inlined_call_operand.vmem [shape: f32[1,16], index: 7, kind: input, shape index: {}]   ;;  %s2586_s8 = inlined_call_operand.vmem [shape: f32[16,128], index: 8, kind: input, shape index: {}]   ;;  %s2587_s9 = inlined_call_operand.vmem [shape: f32[1,128], index: 9, kind: input, shape index: {}]   ;;  %s2588_s10 = inlined_call_operand.hbm [shape: f32[8,128], index: 10, kind: output, shape index: {}]  }
   0x1   :  { %v2202_v0 = vld [vmem:[%s2580_s2 + $0x18] sm:$0xff]  ;;  %1826 = vmatprep.subr.mxu0 %v2131_v1  ;;  %v2208_v2 = vld [vmem:[%s2580_s2 + $0x10] sm:$0xff]  ;;  %1834 = vmatprep.mubr.msk.f32.mxu0 %vm2132_vm0, %v2131_v1  ;;  %v2215_v3 = vld [vmem:[%s2578_s0] sm:$0xff] }
   0x2   :  { %1827 = vmatpush3.msra.mxu0 %v2202_v0  ;;  %2033 = vset.pattern.permute.xlu0 %v2133_v4 }
   0x3   :  { %15 = vsyncpa [#allocation3], 0  ;;  %1828 = vmatprep.subr.mxu0 %v2131_v1  ;;  %v2222_v5 = vld [vmem:[%s2580_s2 + $0x8] sm:$0xff]  ;;  %45 = vperm.xlu0 %2033, %v2215_v3   ;;  %v2231_v6 = vld [vmem:[%s2580_s2] sm:$0xff]  ;;  %s2134_s25 = smov 32   ;;  %v2135_v26 = vmov 1  }
   0x4   :  { %1829 = vmatpush3.msra.mxu0 %v2208_v2  ;;  %1837 = vmatprep.subr.mxu1 %v2131_v1  ;;  %v2253_v7 = vld [vmem:[%s2579_s1] ss:$0 sm:$0xff]  ;;  %s2136_s1 = smov 64   ;;  %vm62_vm1 = vcmask 261120   ;;  %v164_v29 = vld [vmem:[%s2582_s4 + $0x18] sm:$0xff]  ;;  %v163_v31 = vld [vmem:[%s2582_s4 + $0x10] sm:$0xff] }
   0x5   :  { %1830 = vmatprep.subr.mxu0 %v2131_v1  ;;  %1838 = vmatpush3.msra.mxu1 %v2202_v0  ;;  %v2259_v10 = vld [vmem:[%s2581_s3] ss:$0 sm:$0xff]  ;;  %v162_v32 = vld [vmem:[%s2582_s4 + $0x8] sm:$0xff]  ;;  %v274_v52 = vld [vmem:[%s2582_s4 + $0x38] sm:$0xff]  ;;  %v2137_v57 = vmov 2   ;;  %vm1608_vm2 = vcmask 130048  }
   0x6   :  { %1831 = vmatpush3.msra.mxu0 %v2222_v5  ;;  %1839 = vmatprep.subr.mxu1 %v2131_v1  ;;  %v161_v33 = vld [vmem:[%s2582_s4] sm:$0xff]  ;;  %v273_v53 = vld [vmem:[%s2582_s4 + $0x30] sm:$0xff]  ;;  %v272_v54 = vld [vmem:[%s2582_s4 + $0x28] sm:$0xff] }
   0x7   :  { %1832 = vmatprep.subr.mxu0 %v2131_v1  ;;  %1840 = vmatpush3.msra.mxu1 %v2208_v2  ;;  %v271_v55 = vld [vmem:[%s2582_s4 + $0x20] sm:$0xff] }
   0x8   :  { %1833 = vmatpush3.msra.mxu0 %v2231_v6  ;;  %1841 = vmatprep.subr.mxu1 %v2131_v1 }
   0x9   :  { %1835 = vmatmul.mubr.f32.vlgmr.msra.gmra.mxu0 %v2131_v1  ;;  %1842 = vmatpush3.msra.mxu1 %v2222_v5 }
   0xa   :  { %1843 = vmatprep.subr.mxu1 %v2131_v1  ;;  %1845 = vmatprep.mubr.msk.f32.mxu1 %vm2132_vm0, %v2131_v1 }
   0xb   :  { %1844 = vmatpush3.msra.mxu1 %v2231_v6  ;;  %1848 = vmatprep.subr.mxu0 %v2131_v1 }
   0xc   :  { %1859 = vmatprep.subr.mxu1 %v2131_v1  ;;  %1856 = vmatprep.mubr.msk.f32.mxu0 %vm2132_vm0, %v2131_v1 }
   0xd   :  { %2034 = vset.pattern.permute.xlu1 %v2135_v26  ;;  %1849 = vmatpush3.msra.mxu0 %v274_v52  ;;  %v521_v26 = vld [vmem:[%s2582_s4 + $0x40] sm:$0xff]  ;;  %v705_v52 = vld [vmem:[%s2582_s4 + $0x78] sm:$0xff] }
   0xe   :  { %1850 = vmatprep.subr.mxu0 %v2131_v1  ;;  %2035 = vset.pattern.permute.xlu0 %v2137_v57  ;;  %v2139_v57 = vmov 4  }
   0xf   :  { %1851 = vmatpush3.msra.mxu0 %v273_v53  ;;  %v704_v53 = vld [vmem:[%s2582_s4 + $0x70] sm:$0xff] }
  0x10   :  { %1852 = vmatprep.subr.mxu0 %v2131_v1 }
  0x11   :  { %1853 = vmatpush3.msra.mxu0 %v272_v54  ;;  %v703_v54 = vld [vmem:[%s2582_s4 + $0x68] sm:$0xff] }
  0x12   :  { %1854 = vmatprep.subr.mxu0 %v2131_v1 }
  0x13   :  { %1855 = vmatpush3.msra.mxu0 %v271_v55  ;;  %v702_v55 = vld [vmem:[%s2582_s4 + $0x60] sm:$0xff] }
  0x14   :  { %1870 = vmatprep.subr.mxu0 %v2131_v1 }
  0x7e   :  { %v46_v8 = vpop.permute.xlu0 %45 }
  0x7f   :  { %v54_v9 = vmul.f32 %v2253_v7, %v46_v8 }
  0x81   :  { %v61_v11 = vadd.f32 %v2259_v10, %v54_v9 }
  0xc9   :  { %v132_v12 = vpop.f32.mrf.mxu0 }
  0xca   :  { %v136_v13 = vadd.f32 %v132_v12, %v61_v11 }
  0xcb   :  { %v1836_v14 = vpop.f32.mrf.mxu0 }
  0xcc   :  { %2041 = vtanh.f32 %v136_v13  ;;  %v1710_v16 = vmul.f32 -1.442695, %v136_v13 }
  0xce   :  { %2043 = vpow2.f32 %v1710_v16 }
  0xd9   :  { %v2042_v15 = vpop.eup %2041 }
  0xda   :  { %146 = vrot.lane.b32.xlu0 %v2042_v15, %s2134_s25 }
  0xdb   :  { %v2044_v17 = vpop.eup %2043 }
  0xdc   :  { %v140_v18 = vadd.f32 1.0, %v2044_v17 }
  0xde   :  { %2045 = vrcp.f32 %v140_v18 }
  0xeb   :  { %v2046_v19 = vpop.eup %2045 }
  0xec   :  { %v144_v22 = vmul.f32 0.0, %v2046_v19 }
 0x14c   :  { %v147_v20 = vpop.permute.xlu0 %146 }
 0x14d   :  { %v149_v21 = vmul.f32 %v2046_v19, %v147_v20 }
 0x14f   :  { %151 = vrot.lane.b32.xlu1 %v149_v21, %s2134_s25 }
 0x1c1   :  { %v152_v23 = vpop.permute.xlu1 %151 }
 0x1c2   :  { %v154_v24 = vadd.f32 %v152_v23, %v144_v22  ;;  %v524_v23 = vld [vmem:[%s2582_s4 + $0x58] sm:$0xff] }
 0x1c4   :  { %2047 = vtanh.f32 %v154_v24 }
 0x1d1   :  { %v2048_v25 = vpop.eup %2047 }
 0x1d2   :  { %157 = vrot.lane.b32.xlu1 %v2048_v25, %s2134_s25  ;;  %v522_v25 = vld [vmem:[%s2582_s4 + $0x48] sm:$0xff] }
 0x1d6   :  { %166 = vperm.xlu1 %2034, %v2215_v3  }
 0x244   :  { %v158_v27 = vpop.permute.xlu1 %157 }
 0x245   :  { %v160_v28 = vmul.f32 %v2046_v19, %v158_v27 }
 0x247   :  { %172 = vrot.lane.b32.xlu0 %v160_v28, %s2136_s1  ;;  %v2138_v28 = vmov 3  }
 0x251   :  { %v167_v34 = vpop.permute.xlu1 %166 }
 0x252   :  { %v169_v35 = vmul.f32 %v2253_v7, %v167_v34 }
 0x254   :  { %v170_v36 = vadd.f32 %v2259_v10, %v169_v35 }
 0x2b9   :  { %v173_v30 = vpop.permute.xlu0 %172 }
 0x2ba   :  { %1846 = vmatmul.mubr.msk.f32.vlgmr.msra.gmra.mxu1 %vm62_vm1, %v173_v30 }
 0x2bb   :  { %1860 = vmatpush3.msra.mxu1 %v164_v29  ;;  %1867 = vmatprep.mubr.msk.f32.mxu1 %vm2132_vm0, %v2131_v1 }
 0x2bc   :  { %1861 = vmatprep.subr.mxu1 %v2131_v1 }
 0x2bd   :  { %1862 = vmatpush3.msra.mxu1 %v163_v31 }
 0x2be   :  { %1863 = vmatprep.subr.mxu1 %v2131_v1 }
 0x2bf   :  { %1864 = vmatpush3.msra.mxu1 %v162_v32 }
 0x2c0   :  { %1865 = vmatprep.subr.mxu1 %v2131_v1 }
 0x2c1   :  { %1866 = vmatpush3.msra.mxu1 %v161_v33 }
 0x2c2   :  { %1868 = vmatmul.mubr.msk.f32.vlgmr.msra.gmra.mxu1 %vm62_vm1, %v173_v30  ;;  %1881 = vmatprep.subr.mxu1 %v2131_v1 }
 0x2c3   :  { %1889 = vmatprep.mubr.msk.f32.mxu1 %vm2132_vm0, %v2131_v1  ;;  %1882 = vmatpush3.msra.mxu1 %v524_v23 }
 0x2c4   :  { %1883 = vmatprep.subr.mxu1 %v2131_v1 }
 0x37a   :  { %v242_v37 = vpop.f32.mrf.mxu1 }
 0x37b   :  { %v246_v38 = vadd.f32 %v242_v37, %v170_v36 }
 0x37c   :  { %v1847_v39 = vpop.f32.mrf.mxu1 }
 0x37d   :  { %2049 = vtanh.f32 %v246_v38  ;;  %v1712_v43 = vmul.f32 -1.442695, %v246_v38 }
 0x37f   :  { %2051 = vpow2.f32 %v1712_v43 }
 0x382   :  { %v2291_v40 = vpop.f32.mrf.mxu1 }
 0x384   :  { %v1869_v41 = vpop.f32.mrf.mxu1 }
 0x38a   :  { %v2050_v42 = vpop.eup %2049 }
 0x38b   :  { %256 = vrot.lane.b32.xlu0 %v2050_v42, %s2134_s25 }
 0x38c   :  { %v2052_v44 = vpop.eup %2051 }
 0x38d   :  { %v250_v45 = vadd.f32 1.0, %v2052_v44 }
 0x38f   :  { %2053 = vrcp.f32 %v250_v45 }
 0x39c   :  { %v2054_v46 = vpop.eup %2053 }
 0x39d   :  { %v254_v49 = vmul.f32 %v2054_v46, %v154_v24  ;;  %v523_v24 = vld [vmem:[%s2582_s4 + $0x50] sm:$0xff] }
 0x39e   :  { %1884 = vmatpush3.msra.mxu1 %v523_v24  ;;  %v886_v24 = vld [vmem:[%s2582_s4 + $0x98] sm:$0xff] }
 0x39f   :  { %1885 = vmatprep.subr.mxu1 %v2131_v1 }
 0x3a0   :  { %1886 = vmatpush3.msra.mxu1 %v522_v25  ;;  %v885_v25 = vld [vmem:[%s2582_s4 + $0x90] sm:$0xff] }
 0x3a1   :  { %1887 = vmatprep.subr.mxu1 %v2131_v1 }
 0x3a2   :  { %1888 = vmatpush3.msra.mxu1 %v521_v26  ;;  %v884_v26 = vld [vmem:[%s2582_s4 + $0x88] sm:$0xff] }
 0x3a3   :  { %1903 = vmatprep.subr.mxu1 %v2131_v1 }
 0x3fd   :  { %v257_v47 = vpop.permute.xlu0 %256 }
 0x3fe   :  { %v259_v48 = vmul.f32 %v2054_v46, %v257_v47 }
 0x400   :  { %261 = vrot.lane.b32.xlu1 %v259_v48, %s2134_s25 }
 0x472   :  { %v262_v50 = vpop.permute.xlu1 %261 }
 0x473   :  { %v2295_v51 = vadd.f32 %v262_v50, %v254_v49 }
 0x475   :  { %2055 = vtanh.f32 %v2295_v51 }
 0x482   :  { %v2056_v56 = vpop.eup %2055 }
 0x483   :  { %267 = vrot.lane.b32.xlu0 %v2056_v56, %s2134_s25 }
 0x487   :  { %421 = vperm.xlu0 %2035, %v2215_v3  }
 0x48b   :  { %2036 = vset.pattern.permute.xlu0 %v2138_v28 }
 0x4f5   :  { %v268_v58 = vpop.permute.xlu0 %267 }
 0x4f6   :  { %v270_v59 = vmul.f32 %v2054_v46, %v268_v58 }
 0x4f8   :  { %276 = vrot.lane.b32.xlu1 %v270_v59, %s2136_s1 }
 0x502   :  { %v422_v61 = vpop.permute.xlu0 %421 }
 0x503   :  { %v424_v63 = vmul.f32 %v2253_v7, %v422_v61 }
 0x505   :  { %v425_v8 = vadd.f32 %v2259_v10, %v424_v63 }
 0x56a   :  { %v277_v60 = vpop.permute.xlu1 %276 }
 0x56b   :  { %1857 = vmatmul.mubr.msk.f32.vlgmr.msra.gmra.mxu0 %vm62_vm1, %v277_v60 }
 0x56c   :  { %1871 = vmatpush3.msra.mxu0 %v2202_v0  ;;  %1878 = vmatprep.mubr.msk.f32.mxu0 %vm2132_vm0, %v2131_v1 }
 0x56d   :  { %1872 = vmatprep.subr.mxu0 %v2131_v1 }
 0x56e   :  { %1873 = vmatpush3.msra.mxu0 %v2208_v2 }
 0x56f   :  { %1874 = vmatprep.subr.mxu0 %v2131_v1 }
 0x570   :  { %1875 = vmatpush3.msra.mxu0 %v2222_v5 }
 0x571   :  { %1876 = vmatprep.subr.mxu0 %v2131_v1 }
 0x572   :  { %1877 = vmatpush3.msra.mxu0 %v2231_v6 }
 0x573   :  { %1879 = vmatmul.mubr.msk.f32.vlgmr.msra.gmra.mxu0 %vm62_vm1, %v277_v60  ;;  %1892 = vmatprep.subr.mxu0 %v2131_v1 }
 0x574   :  { %1893 = vmatpush3.msra.mxu0 %v2202_v0  ;;  %1900 = vmatprep.mubr.msk.f32.mxu0 %vm2132_vm0, %v2131_v1 }
 0x575   :  { %1894 = vmatprep.subr.mxu0 %v2131_v1 }
 0x576   :  { %1895 = vmatpush3.msra.mxu0 %v2208_v2 }
 0x577   :  { %1896 = vmatprep.subr.mxu0 %v2131_v1 }
 0x578   :  { %1897 = vmatpush3.msra.mxu0 %v2222_v5 }
 0x579   :  { %1898 = vmatprep.subr.mxu0 %v2131_v1 }
 0x57a   :  { %1899 = vmatpush3.msra.mxu0 %v2231_v6 }
 0x57b   :  { %1914 = vmatprep.subr.mxu0 %v2131_v1 }
 0x62b   :  { %v346_v62 = vpop.f32.mrf.mxu0 }
 0x62c   :  { %v417_v35 = vadd.f32 %v2291_v40, %v346_v62 }
 0x62d   :  { %v1858_v4 = vpop.f32.mrf.mxu0 }
 0x633   :  { %v492_v9 = vpop.f32.mrf.mxu0 }
 0x634   :  { %v496_v11 = vadd.f32 %v492_v9, %v425_v8 }
 0x635   :  { %v1880_v12 = vpop.f32.mrf.mxu0 }
 0x636   :  { %2057 = vtanh.f32 %v496_v11  ;;  %v1716_v14 = vmul.f32 -1.442695, %v496_v11 }
 0x638   :  { %2059 = vpow2.f32 %v1716_v14 }
 0x643   :  { %v2058_v13 = vpop.eup %2057 }
 0x644   :  { %506 = vrot.lane.b32.xlu1 %v2058_v13, %s2134_s25 }
 0x645   :  { %v2060_v15 = vpop.eup %2059 }
 0x646   :  { %v500_v16 = vadd.f32 1.0, %v2060_v15 }
 0x648   :  { %2061 = vrcp.f32 %v500_v16 }
 0x655   :  { %v2062_v17 = vpop.eup %2061 }
 0x656   :  { %v504_v20 = vmul.f32 %v2062_v17, %v2295_v51 }
 0x6b6   :  { %v507_v18 = vpop.permute.xlu1 %506 }
 0x6b7   :  { %v509_v19 = vmul.f32 %v2062_v17, %v507_v18 }
 0x6b9   :  { %511 = vrot.lane.b32.xlu1 %v509_v19, %s2134_s25 }
 0x72b   :  { %v512_v21 = vpop.permute.xlu1 %511 }
 0x72c   :  { %v514_v22 = vadd.f32 %v512_v21, %v504_v20 }
 0x72e   :  { %2063 = vtanh.f32 %v514_v22 }
 0x73b   :  { %v2064_v27 = vpop.eup %2063 }
 0x73c   :  { %517 = vrot.lane.b32.xlu0 %v2064_v27, %s2134_s25  ;;  %v883_v27 = vld [vmem:[%s2582_s4 + $0x80] sm:$0xff] }
 0x740   :  { %602 = vperm.xlu0 %2036, %v2215_v3  }
 0x744   :  { %2037 = vset.pattern.permute.xlu0 %v2139_v57  ;;  %v2141_v57 = vmov 6  }
 0x7ae   :  { %v518_v29 = vpop.permute.xlu0 %517 }
 0x7af   :  { %v520_v30 = vmul.f32 %v2062_v17, %v518_v29  ;;  %v2140_v29 = vmov 5  }
 0x7b1   :  { %526 = vrot.lane.b32.xlu1 %v520_v30, %s2136_s1 }
 0x7bb   :  { %v603_v32 = vpop.permute.xlu0 %602 }
 0x7bc   :  { %v605_v33 = vmul.f32 %v2253_v7, %v603_v32 }
 0x7be   :  { %v606_v34 = vadd.f32 %v2259_v10, %v605_v33 }
 0x823   :  { %v527_v31 = vpop.permute.xlu1 %526 }
 0x824   :  { %1890 = vmatmul.mubr.msk.f32.vlgmr.msra.gmra.mxu1 %vm62_vm1, %v527_v31  ;;  %1901 = vmatmul.mubr.msk.f32.vlgmr.msra.gmra.mxu0 %vm62_vm1, %v527_v31 }
 0x825   :  { %1915 = vmatpush3.msra.mxu0 %v2202_v0  ;;  %1911 = vmatprep.mubr.msk.f32.mxu1 %vm2132_vm0, %v2131_v1 }
 0x826   :  { %1916 = vmatprep.subr.mxu0 %v2131_v1  ;;  %1922 = vmatprep.mubr.msk.f32.mxu0 %vm2132_vm0, %v2131_v1 }
 0x827   :  { %1917 = vmatpush3.msra.mxu0 %v2208_v2  ;;  %1904 = vmatpush3.msra.mxu1 %v705_v52  ;;  %v1067_v52 = vld [vmem:[%s2582_s4 + $0xb8] sm:$0xff] }
 0x828   :  { %1918 = vmatprep.subr.mxu0 %v2131_v1  ;;  %1905 = vmatprep.subr.mxu1 %v2131_v1 }
 0x829   :  { %1919 = vmatpush3.msra.mxu0 %v2222_v5  ;;  %1906 = vmatpush3.msra.mxu1 %v704_v53  ;;  %v1066_v53 = vld [vmem:[%s2582_s4 + $0xb0] sm:$0xff] }
 0x82a   :  { %1920 = vmatprep.subr.mxu0 %v2131_v1  ;;  %1907 = vmatprep.subr.mxu1 %v2131_v1 }
 0x82b   :  { %1921 = vmatpush3.msra.mxu0 %v2231_v6  ;;  %1908 = vmatpush3.msra.mxu1 %v703_v54  ;;  %v1065_v54 = vld [vmem:[%s2582_s4 + $0xa8] sm:$0xff] }
 0x82c   :  { %1936 = vmatprep.subr.mxu0 %v2131_v1  ;;  %1909 = vmatprep.subr.mxu1 %v2131_v1 }
 0x82d   :  { %1910 = vmatpush3.msra.mxu1 %v702_v55  ;;  %v1064_v55 = vld [vmem:[%s2582_s4 + $0xa0] sm:$0xff] }
 0x82e   :  { %1925 = vmatprep.subr.mxu1 %v2131_v1 }
 0x8e4   :  { %v596_v36 = vpop.f32.mrf.mxu1  ;;  %v673_v37 = vpop.f32.mrf.mxu0 }
 0x8e5   :  { %v600_v38 = vadd.f32 %v596_v36, %v417_v35  ;;  %v677_v39 = vadd.f32 %v673_v37, %v606_v34 }
 0x8e6   :  { %v1891_v41 = vpop.f32.mrf.mxu1  ;;  %v1902_v42 = vpop.f32.mrf.mxu0 }
 0x8e7   :  { %2065 = vtanh.f32 %v677_v39  ;;  %v1719_v44 = vmul.f32 -1.442695, %v677_v39 }
 0x8e9   :  { %2067 = vpow2.f32 %v1719_v44 }
 0x8f4   :  { %v2066_v43 = vpop.eup %2065 }
 0x8f5   :  { %687 = vrot.lane.b32.xlu1 %v2066_v43, %s2134_s25 }
 0x8f6   :  { %v2068_v45 = vpop.eup %2067 }
 0x8f7   :  { %v681_v46 = vadd.f32 1.0, %v2068_v45 }
 0x8f9   :  { %2069 = vrcp.f32 %v681_v46 }
 0x906   :  { %v2070_v47 = vpop.eup %2069 }
 0x907   :  { %v685_v40 = vmul.f32 %v2070_v47, %v514_v22 }
 0x967   :  { %v688_v48 = vpop.permute.xlu1 %687 }
 0x968   :  { %v690_v49 = vmul.f32 %v2070_v47, %v688_v48 }
 0x96a   :  { %692 = vrot.lane.b32.xlu1 %v690_v49, %s2134_s25 }
 0x9dc   :  { %v693_v50 = vpop.permute.xlu1 %692 }
 0x9dd   :  { %v695_v51 = vadd.f32 %v693_v50, %v685_v40 }
 0x9df   :  { %2071 = vtanh.f32 %v695_v51 }
 0x9ec   :  { %v2072_v56 = vpop.eup %2071 }
 0x9ed   :  { %698 = vrot.lane.b32.xlu0 %v2072_v56, %s2134_s25 }
 0x9f1   :  { %783 = vperm.xlu0 %2037, %v2215_v3  }
 0x9f5   :  { %2038 = vset.pattern.permute.xlu0 %v2140_v29 }
 0xa5f   :  { %v699_v58 = vpop.permute.xlu0 %698 }
 0xa60   :  { %v701_v59 = vmul.f32 %v2070_v47, %v699_v58 }
 0xa62   :  { %707 = vrot.lane.b32.xlu1 %v701_v59, %s2136_s1 }
 0xa6c   :  { %v784_v61 = vpop.permute.xlu0 %783 }
 0xa6d   :  { %v786_v62 = vmul.f32 %v2253_v7, %v784_v61 }
 0xa6f   :  { %v787_v63 = vadd.f32 %v2259_v10, %v786_v62 }
 0xad4   :  { %v708_v60 = vpop.permute.xlu1 %707 }
 0xad5   :  { %1912 = vmatmul.mubr.msk.f32.vlgmr.msra.gmra.mxu1 %vm62_vm1, %v708_v60  ;;  %1923 = vmatmul.mubr.msk.f32.vlgmr.msra.gmra.mxu0 %vm62_vm1, %v708_v60 }
 0xad6   :  { %1937 = vmatpush3.msra.mxu0 %v2202_v0  ;;  %1933 = vmatprep.mubr.msk.f32.mxu1 %vm2132_vm0, %v2131_v1 }
 0xad7   :  { %1938 = vmatprep.subr.mxu0 %v2131_v1  ;;  %1944 = vmatprep.mubr.msk.f32.mxu0 %vm2132_vm0, %v2131_v1 }
 0xad8   :  { %1939 = vmatpush3.msra.mxu0 %v2208_v2  ;;  %1926 = vmatpush3.msra.mxu1 %v886_v24 }
 0xad9   :  { %1940 = vmatprep.subr.mxu0 %v2131_v1  ;;  %1927 = vmatprep.subr.mxu1 %v2131_v1 }
 0xada   :  { %1941 = vmatpush3.msra.mxu0 %v2222_v5  ;;  %1928 = vmatpush3.msra.mxu1 %v885_v25  ;;  %v2142_v25 = vmov 7  }
 0xadb   :  { %1942 = vmatprep.subr.mxu0 %v2131_v1  ;;  %1929 = vmatprep.subr.mxu1 %v2131_v1 }
 0xadc   :  { %1943 = vmatpush3.msra.mxu0 %v2231_v6  ;;  %1930 = vmatpush3.msra.mxu1 %v884_v26 }
 0xadd   :  { %1958 = vmatprep.subr.mxu0 %v2131_v1  ;;  %1931 = vmatprep.subr.mxu1 %v2131_v1 }
 0xade   :  { %1932 = vmatpush3.msra.mxu1 %v883_v27 }
 0xadf   :  { %1947 = vmatprep.subr.mxu1 %v2131_v1 }
 0xb95   :  { %v777_v4 = vpop.f32.mrf.mxu1  ;;  %v854_v8 = vpop.f32.mrf.mxu0 }
 0xb96   :  { %v781_v9 = vadd.f32 %v777_v4, %v600_v38  ;;  %v858_v11 = vadd.f32 %v854_v8, %v787_v63 }
 0xb97   :  { %v1913_v12 = vpop.f32.mrf.mxu1  ;;  %v1924_v13 = vpop.f32.mrf.mxu0 }
 0xb98   :  { %2073 = vtanh.f32 %v858_v11  ;;  %v1722_v15 = vmul.f32 -1.442695, %v858_v11 }
 0xb9a   :  { %2075 = vpow2.f32 %v1722_v15 }
 0xba5   :  { %v2074_v14 = vpop.eup %2073 }
 0xba6   :  { %868 = vrot.lane.b32.xlu1 %v2074_v14, %s2134_s25 }
 0xba7   :  { %v2076_v16 = vpop.eup %2075 }
 0xba8   :  { %v862_v17 = vadd.f32 1.0, %v2076_v16 }
 0xbaa   :  { %2077 = vrcp.f32 %v862_v17 }
 0xbb7   :  { %v2078_v18 = vpop.eup %2077 }
 0xbb8   :  { %v866_v21 = vmul.f32 %v2078_v18, %v695_v51 }
 0xc18   :  { %v869_v19 = vpop.permute.xlu1 %868 }
 0xc19   :  { %v871_v20 = vmul.f32 %v2078_v18, %v869_v19 }
 0xc1b   :  { %873 = vrot.lane.b32.xlu1 %v871_v20, %s2134_s25  ;;  %v1248_v20 = vld [vmem:[%s2582_s4 + $0xd8] sm:$0xff] }
 0xc8d   :  { %v874_v22 = vpop.permute.xlu1 %873 }
 0xc8e   :  { %v876_v23 = vadd.f32 %v874_v22, %v866_v21  ;;  %v1247_v21 = vld [vmem:[%s2582_s4 + $0xd0] sm:$0xff]  ;;  %v1246_v22 = vld [vmem:[%s2582_s4 + $0xc8] sm:$0xff] }
 0xc90   :  { %2079 = vtanh.f32 %v876_v23 }
 0xc9d   :  { %v2080_v28 = vpop.eup %2079 }
 0xc9e   :  { %879 = vrot.lane.b32.xlu0 %v2080_v28, %s2134_s25 }
 0xca2   :  { %964 = vperm.xlu0 %2038, %v2215_v3  }
 0xca6   :  { %2039 = vset.pattern.permute.xlu0 %v2141_v57  ;;  %v1600_v57 = vld [vmem:[%s2586_s8 + $0x8] sm:$0xff] }
 0xd10   :  { %v880_v30 = vpop.permute.xlu0 %879 }
 0xd11   :  { %v882_v31 = vmul.f32 %v2078_v18, %v880_v30 }
 0xd13   :  { %888 = vrot.lane.b32.xlu1 %v882_v31, %s2136_s1 }
 0xd1d   :  { %v965_v33 = vpop.permute.xlu0 %964 }
 0xd1e   :  { %v967_v34 = vmul.f32 %v2253_v7, %v965_v33 }
 0xd20   :  { %v968_v35 = vadd.f32 %v2259_v10, %v967_v34 }
 0xd85   :  { %v889_v32 = vpop.permute.xlu1 %888 }
 0xd86   :  { %1934 = vmatmul.mubr.msk.f32.vlgmr.msra.gmra.mxu1 %vm62_vm1, %v889_v32  ;;  %1945 = vmatmul.mubr.msk.f32.vlgmr.msra.gmra.mxu0 %vm62_vm1, %v889_v32 }
 0xd87   :  { %1959 = vmatpush3.msra.mxu0 %v2202_v0  ;;  %1955 = vmatprep.mubr.msk.f32.mxu1 %vm2132_vm0, %v2131_v1 }
 0xd88   :  { %1960 = vmatprep.subr.mxu0 %v2131_v1  ;;  %1966 = vmatprep.mubr.msk.f32.mxu0 %vm2132_vm0, %v2131_v1 }
 0xd89   :  { %1961 = vmatpush3.msra.mxu0 %v2208_v2  ;;  %1948 = vmatpush3.msra.mxu1 %v1067_v52 }
 0xd8a   :  { %1962 = vmatprep.subr.mxu0 %v2131_v1  ;;  %1949 = vmatprep.subr.mxu1 %v2131_v1 }
 0xd8b   :  { %1963 = vmatpush3.msra.mxu0 %v2222_v5  ;;  %1950 = vmatpush3.msra.mxu1 %v1066_v53  ;;  %v1518_v53 = vld [vmem:[%s2584_s6 + $0x18] sm:$0xff] }
 0xd8c   :  { %1964 = vmatprep.subr.mxu0 %v2131_v1  ;;  %1951 = vmatprep.subr.mxu1 %v2131_v1 }
 0xd8d   :  { %1965 = vmatpush3.msra.mxu0 %v2231_v6  ;;  %1952 = vmatpush3.msra.mxu1 %v1065_v54  ;;  %v1517_v54 = vld [vmem:[%s2584_s6 + $0x10] sm:$0xff] }
 0xd8e   :  { %1980 = vmatprep.subr.mxu0 %v2131_v1  ;;  %1953 = vmatprep.subr.mxu1 %v2131_v1 }
 0xd8f   :  { %1954 = vmatpush3.msra.mxu1 %v1064_v55  ;;  %v1516_v55 = vld [vmem:[%s2584_s6 + $0x8] sm:$0xff] }
 0xd90   :  { %1969 = vmatprep.subr.mxu1 %v2131_v1 }
 0xe46   :  { %v958_v36 = vpop.f32.mrf.mxu1  ;;  %v1035_v37 = vpop.f32.mrf.mxu0 }
 0xe47   :  { %v962_v38 = vadd.f32 %v958_v36, %v781_v9  ;;  %v1039_v39 = vadd.f32 %v1035_v37, %v968_v35 }
 0xe48   :  { %v1935_v41 = vpop.f32.mrf.mxu1  ;;  %v1946_v42 = vpop.f32.mrf.mxu0 }
 0xe49   :  { %2081 = vtanh.f32 %v1039_v39  ;;  %v1725_v44 = vmul.f32 -1.442695, %v1039_v39 }
 0xe4b   :  { %2083 = vpow2.f32 %v1725_v44 }
 0xe56   :  { %v2082_v43 = vpop.eup %2081 }
 0xe57   :  { %1049 = vrot.lane.b32.xlu1 %v2082_v43, %s2134_s25 }
 0xe58   :  { %v2084_v45 = vpop.eup %2083 }
 0xe59   :  { %v1043_v46 = vadd.f32 1.0, %v2084_v45 }
 0xe5b   :  { %2085 = vrcp.f32 %v1043_v46  ;;  %v1429_v46 = vld [vmem:[%s2582_s4 + $0xf8] sm:$0xff] }
 0xe68   :  { %v2086_v47 = vpop.eup %2085 }
 0xe69   :  { %v1047_v40 = vmul.f32 %v2086_v47, %v876_v23  ;;  %v1245_v23 = vld [vmem:[%s2582_s4 + $0xc0] sm:$0xff] }
 0xec9   :  { %v1050_v48 = vpop.permute.xlu1 %1049 }
 0xeca   :  { %v1052_v49 = vmul.f32 %v2086_v47, %v1050_v48  ;;  %v1427_v48 = vld [vmem:[%s2582_s4 + $0xe8] sm:$0xff] }
 0xecc   :  { %1054 = vrot.lane.b32.xlu1 %v1052_v49, %s2134_s25  ;;  %v1426_v49 = vld [vmem:[%s2582_s4 + $0xe0] sm:$0xff] }
 0xf3e   :  { %v1055_v50 = vpop.permute.xlu1 %1054 }
 0xf3f   :  { %v1057_v51 = vadd.f32 %v1055_v50, %v1047_v40 }
 0xf41   :  { %2087 = vtanh.f32 %v1057_v51 }
 0xf4e   :  { %v2088_v56 = vpop.eup %2087 }
 0xf4f   :  { %1060 = vrot.lane.b32.xlu0 %v2088_v56, %s2134_s25  ;;  %v1515_v56 = vld [vmem:[%s2584_s6] sm:$0xff] }
 0xf53   :  { %1145 = vperm.xlu0 %2039, %v2215_v3  }
 0xf57   :  { %2040 = vset.pattern.permute.xlu0 %v2142_v25 }
 0xfc1   :  { %v1061_v58 = vpop.permute.xlu0 %1060 }
 0xfc2   :  { %v1063_v59 = vmul.f32 %v2086_v47, %v1061_v58  ;;  %v1428_v47 = vld [vmem:[%s2582_s4 + $0xf0] sm:$0xff] }
 0xfc4   :  { %1069 = vrot.lane.b32.xlu1 %v1063_v59, %s2136_s1  ;;  %v1733_v59 = vld [vmem:[%s2583_s5] ss:$0 sm:$0xff] }
0x1036   :  { %v1070_v60 = vpop.permute.xlu1 %1069 }
0x1037   :  { %1956 = vmatmul.mubr.msk.f32.vlgmr.msra.gmra.mxu1 %vm62_vm1, %v1070_v60  ;;  %1967 = vmatmul.mubr.msk.f32.vlgmr.msra.gmra.mxu0 %vm62_vm1, %v1070_v60 }
0x1038   :  { %1981 = vmatpush3.msra.mxu0 %v2202_v0  ;;  %1977 = vmatprep.mubr.msk.f32.mxu1 %vm2132_vm0, %v2131_v1  ;;  %v1146_v0 = vpop.permute.xlu0 %1145 }
0x1039   :  { %1982 = vmatprep.subr.mxu0 %v2131_v1  ;;  %1988 = vmatprep.mubr.msk.f32.mxu0 %vm2132_vm0, %v2131_v1  ;;  %v1148_v61 = vmul.f32 %v2253_v7, %v1146_v0 }
0x103a   :  { %1983 = vmatpush3.msra.mxu0 %v2208_v2  ;;  %1970 = vmatpush3.msra.mxu1 %v1248_v20 }
0x103b   :  { %1984 = vmatprep.subr.mxu0 %v2131_v1  ;;  %v1149_v62 = vadd.f32 %v2259_v10, %v1148_v61  ;;  %1971 = vmatprep.subr.mxu1 %v2131_v1 }
0x103c   :  { %1985 = vmatpush3.msra.mxu0 %v2222_v5  ;;  %1972 = vmatpush3.msra.mxu1 %v1247_v21 }
0x103d   :  { %1986 = vmatprep.subr.mxu0 %v2131_v1  ;;  %1973 = vmatprep.subr.mxu1 %v2131_v1 }
0x103e   :  { %1987 = vmatpush3.msra.mxu0 %v2231_v6  ;;  %1974 = vmatpush3.msra.mxu1 %v1246_v22 }
0x103f   :  { %2002 = vmatprep.subr.mxu0 %v2131_v1  ;;  %1975 = vmatprep.subr.mxu1 %v2131_v1 }
0x1040   :  { %1976 = vmatpush3.msra.mxu1 %v1245_v23 }
0x1041   :  { %1991 = vmatprep.subr.mxu1 %v2131_v1 }
0x10f7   :  { %v1139_v63 = vpop.f32.mrf.mxu1  ;;  %v1216_v4 = vpop.f32.mrf.mxu0 }
0x10f8   :  { %v1143_v8 = vadd.f32 %v1139_v63, %v962_v38  ;;  %v1220_v9 = vadd.f32 %v1216_v4, %v1149_v62  ;;  %v1599_v63 = vld [vmem:[%s2586_s8] sm:$0xff] }
0x10f9   :  { %v1957_v2 = vpop.f32.mrf.mxu1  ;;  %v1968_v11 = vpop.f32.mrf.mxu0 }
0x10fa   :  { %2089 = vtanh.f32 %v1220_v9  ;;  %v1728_v5 = vmul.f32 -1.442695, %v1220_v9  ;;  %v1736_v2 = vld [vmem:[%s2587_s9] ss:$0 sm:$0xff] }
0x10fc   :  { %2091 = vpow2.f32 %v1728_v5 }
0x1107   :  { %v2090_v12 = vpop.eup %2089 }
0x1108   :  { %1230 = vrot.lane.b32.xlu1 %v2090_v12, %s2134_s25 }
0x1109   :  { %v2092_v6 = vpop.eup %2091 }
0x110a   :  { %v1224_v13 = vadd.f32 1.0, %v2092_v6 }
0x110c   :  { %2093 = vrcp.f32 %v1224_v13 }
0x1119   :  { %v2094_v14 = vpop.eup %2093 }
0x111a   :  { %v1228_v17 = vmul.f32 %v2094_v14, %v1057_v51 }
0x117a   :  { %v1231_v15 = vpop.permute.xlu1 %1230 }
0x117b   :  { %v1233_v16 = vmul.f32 %v2094_v14, %v1231_v15 }
0x117d   :  { %1235 = vrot.lane.b32.xlu1 %v1233_v16, %s2134_s25 }
0x11ef   :  { %v1236_v18 = vpop.permute.xlu1 %1235 }
0x11f0   :  { %v1238_v19 = vadd.f32 %v1236_v18, %v1228_v17 }
0x11f2   :  { %2095 = vtanh.f32 %v1238_v19 }
0x11ff   :  { %v2096_v24 = vpop.eup %2095 }
0x1200   :  { %1241 = vrot.lane.b32.xlu0 %v2096_v24, %s2134_s25 }
0x1204   :  { %1326 = vperm.xlu0 %2040, %v2215_v3  }
0x1272   :  { %v1242_v26 = vpop.permute.xlu0 %1241 }
0x1273   :  { %v1244_v27 = vmul.f32 %v2094_v14, %v1242_v26 }
0x1275   :  { %1250 = vrot.lane.b32.xlu1 %v1244_v27, %s2136_s1 }
0x127f   :  { %v1327_v29 = vpop.permute.xlu0 %1326 }
0x1280   :  { %v1329_v30 = vmul.f32 %v2253_v7, %v1327_v29 }
0x1282   :  { %v1330_v3 = vadd.f32 %v2259_v10, %v1329_v30 }
0x12e7   :  { %v1251_v28 = vpop.permute.xlu1 %1250 }
0x12e8   :  { %1978 = vmatmul.mubr.msk.f32.vlgmr.msra.gmra.mxu1 %vm62_vm1, %v1251_v28  ;;  %1989 = vmatmul.mubr.msk.f32.vlgmr.msra.gmra.mxu0 %vm62_vm1, %v1251_v28 }
0x12e9   :  { %1999 = vmatprep.mubr.msk.f32.mxu1 %vm2132_vm0, %v2131_v1  ;;  %2010 = vmatprep.mubr.msk.f32.mxu0 %vm2132_vm0, %v2131_v1 }
0x12ea   :  { %1992 = vmatpush3.msra.mxu1 %v1429_v46  ;;  %2003 = vmatpush3.msra.mxu0 %v1518_v53 }
0x12eb   :  { %1993 = vmatprep.subr.mxu1 %v2131_v1  ;;  %2004 = vmatprep.subr.mxu0 %v2131_v1 }
0x12ec   :  { %1994 = vmatpush3.msra.mxu1 %v1428_v47  ;;  %2005 = vmatpush3.msra.mxu0 %v1517_v54 }
0x12ed   :  { %1995 = vmatprep.subr.mxu1 %v2131_v1  ;;  %2006 = vmatprep.subr.mxu0 %v2131_v1 }
0x12ee   :  { %1996 = vmatpush3.msra.mxu1 %v1427_v48  ;;  %2007 = vmatpush3.msra.mxu0 %v1516_v55 }
0x12ef   :  { %1997 = vmatprep.subr.mxu1 %v2131_v1  ;;  %2008 = vmatprep.subr.mxu0 %v2131_v1 }
0x12f0   :  { %1998 = vmatpush3.msra.mxu1 %v1426_v49  ;;  %2009 = vmatpush3.msra.mxu0 %v1515_v56 }
0x12f1   :  { %2013 = vmatprep.subr.mxu1 %v2131_v1 }
0x13a8   :  { %v1320_v31 = vpop.f32.mrf.mxu1  ;;  %v1397_v32 = vpop.f32.mrf.mxu0 }
0x13a9   :  { %v1324_v33 = vadd.f32 %v1320_v31, %v1143_v8  ;;  %v1401_v34 = vadd.f32 %v1397_v32, %v1330_v3 }
0x13aa   :  { %v1979_v35 = vpop.f32.mrf.mxu1  ;;  %v1990_v36 = vpop.f32.mrf.mxu0 }
0x13ab   :  { %2097 = vtanh.f32 %v1401_v34  ;;  %v1731_v38 = vmul.f32 -1.442695, %v1401_v34 }
0x13ad   :  { %2099 = vpow2.f32 %v1731_v38 }
0x13b8   :  { %v2098_v37 = vpop.eup %2097 }
0x13b9   :  { %1411 = vrot.lane.b32.xlu1 %v2098_v37, %s2134_s25 }
0x13ba   :  { %v2100_v39 = vpop.eup %2099 }
0x13bb   :  { %v1405_v41 = vadd.f32 1.0, %v2100_v39 }
0x13bd   :  { %2101 = vrcp.f32 %v1405_v41 }
0x13ca   :  { %v2102_v42 = vpop.eup %2101 }
0x13cb   :  { %v1409_v10 = vmul.f32 %v2102_v42, %v1238_v19 }
0x142b   :  { %v1412_v43 = vpop.permute.xlu1 %1411 }
0x142c   :  { %v1414_v7 = vmul.f32 %v2102_v42, %v1412_v43 }
0x142e   :  { %1416 = vrot.lane.b32.xlu1 %v1414_v7, %s2134_s25 }
0x14a0   :  { %v1417_v44 = vpop.permute.xlu1 %1416 }
0x14a1   :  { %v1419_v45 = vadd.f32 %v1417_v44, %v1409_v10 }
0x14a3   :  { %2103 = vtanh.f32 %v1419_v45 }
0x14b0   :  { %v2104_v40 = vpop.eup %2103 }
0x14b1   :  { %1422 = vrot.lane.b32.xlu0 %v2104_v40, %s2134_s25 }
0x1523   :  { %v1423_v50 = vpop.permute.xlu0 %1422 }
0x1524   :  { %v1425_v51 = vmul.f32 %v2102_v42, %v1423_v50 }
0x1526   :  { %1431 = vrot.lane.b32.xlu1 %v1425_v51, %s2136_s1 }
0x1598   :  { %v1432_v52 = vpop.permute.xlu1 %1431 }
0x1599   :  { %2000 = vmatmul.mubr.msk.f32.vlgmr.msra.gmra.mxu1 %vm62_vm1, %v1432_v52 }
0x159a   :  { %2017 = vmatprep.mubr.msk.f32.mxu1 %vm2132_vm0, %v2131_v1  ;;  %2014 = vmatpush3.msra.mxu1 %v1600_v57 }
0x159b   :  { %2015 = vmatprep.subr.mxu1 %v2131_v1  ;;  %v1734_v1 = vld [vmem:[%s2585_s7] ss:$0 sm:$0xff]  ;;  %s2143_s7 = smov [#allocation2]  }
0x159c   :  { %2016 = vmatpush3.msra.mxu1 %v1599_v63  ;;  %s1700_s8 = sshll.u32 %s2143_s7, 4  ;;  %s1701_s8 = int_to_ptr.vmem [resolvable:$true] %s1700_s8 }
0x159d   :  { %s2109_s9 = scalar_lea.vmem %s1701_s8, 128  ;;  %p2114_p1 = scmp.lt.s32.totalorder %s1701_s8, %s1701_s8 }
0x159e   :  { %p2110_p0 = scmp.ne.s32.totalorder %s1701_s8, %s2109_s9  ;;  %p2115_p2 = scmp.lt.s32.totalorder %s2109_s9, %s2109_s9 }
0x15a0   :  { %p2116_p3 = por %p2115_p2, %p2114_p1 }
0x15a2   :  { %p2117_p4 = pnand %p2116_p3, %p2110_p0 }
0x1659   :  { %v1501_v58 = vpop.f32.mrf.mxu1 }
0x165a   :  { %v1505_v60 = vadd.f32 %v1501_v58, %v1324_v33 }
0x165b   :  { %v2001_v0 = vpop.f32.mrf.mxu1 }
0x165c   :  { %v1513_v61 = vadd.f32 %v1733_v59, %v1505_v60 }
0x165e   :  { %v1514_v62 = vmax.f32 %v1513_v61, 0.0 }
0x1660   :  { %2011 = vmatmul.mubr.msk.f32.vlgmr.msra.gmra.mxu0 %vm62_vm1, %v1514_v62 }
0x1720   :  { %v1595_v4 = vpop.f32.mrf.mxu0 }
0x1721   :  { %v1596_v8 = vadd.f32 %v1734_v1, %v1595_v4 }
0x1722   :  { %v2012_v9 = vpop.f32.mrf.mxu0 }
0x1723   :  { %2018 = vmatmul.mubr.msk.f32.vlgmr.msra.gmra.mxu1 %vm1608_vm2, %v1596_v8 }
0x17e3   :  { %v1678_v11 = vpop.f32.mrf.mxu1 }
0x17e4   :  { %v1679_v12 = vadd.f32 %v1736_v2, %v1678_v11 }
0x17e5   :  { %v2019_v5 = vpop.f32.mrf.mxu1 }
0x17e6   :  { %1682 = vmax.xlane.f32.xlu0 %v1679_v12 }
0x186f   :  { %v1683_v6 = vpop.xlane.xlu0 %1682 }
0x1870   :  { %v1684_v13 = vsub.f32 %v1679_v12, %v1683_v6 }
0x1872   :  { %v1685_v14 = vmul.f32 1.442695, %v1684_v13 }
0x1874   :  { %2105 = vpow2.f32 %v1685_v14 }
0x1881   :  { %v2106_v15 = vpop.eup %2105 }
0x1882   :  { %1687 = vadd.xlane.f32.xlu1 %v2106_v15 }
0x190b   :  { %v1688_v16 = vpop.xlane.xlu1 %1687 }
0x190c   :  { %2107 = vlog2.f32 %v1688_v16 }
0x1919   :  { %v2108_v17 = vpop.eup %2107 }
0x191a   :  { %v1690_v18 = vmul.f32 0.6931472, %v2108_v17 }
0x191c   :  { %v1691_v19 = vadd.f32 %v1690_v18, %v1683_v6 }
0x191e   :  { %v1692_v20 = vsub.f32 %v1679_v12, %v1691_v19 }
0x1920   :  { %1693 = vst [vmem:[#allocation2] sm:$0xff] %v1692_v20 }
0x1921   :  { %2120 = shalt.err (!%p2117_p4)
}
0x1922   :  { %1703 = dma.vmem_to_hbm [thread:$0]  %s1701_s8, 128, %s2588_s10, [#allocation3]  }
0x1923   :  { %2129 = dma.done.wait [#allocation3], 128  }
0x1924   :  { %2130 = vsyncadd [#allocation3], 4294967168 }
0x1925   :  { %1707 = vsyncpa [#allocation3], 1 }

</bundles_post_ra>
